<compile_context>
chip_gen: v7x
topology: tpu7x:2x2x1
jax: 0.10.0
libtpu: 0.0.40
codegen_flags: <defaults>
</compile_context>

<pallas_src>
import math
import numpy as np
import jax
import jax.numpy as jnp
from jax.experimental import pallas as pl
from jax.experimental.pallas import tpu as pltpu  # noqa: F401  (kept for parity)

# ----- small, module-consistent config ---------------------------------------
B, S, H = 2, 8, 32          # batch, seq len, bert_hidden_units
NH, HS = 2, 16              # bert_num_heads, bert_head_size
D = NH * HS                 # attention inner dim (= hidden here)
FF = 4 * H                  # feed-forward hidden (= hidden * 4)
L = 2                       # bert_num_blocks
V = 128                     # vocab / number of items (embedding rows)
EPS = 1e-5                  # nn.LayerNorm default eps
BS = B * S

# rows of the packed per-layer "vector" slab (each row padded to VEC_W lanes)
NVEC = 8
VEC_W = 128                 # = max(H, 3*D, FF)


def _layer_norm(x, g, b):
    # single-pass statistics: var = E[x^2] - mu^2 (independent reductions)
    mu = jnp.mean(x, axis=-1, keepdims=True)
    ms = jnp.mean(x * x, axis=-1, keepdims=True)
    var = jnp.maximum(ms - mu * mu, 0.0)
    return (x - mu) * jax.lax.rsqrt(var + EPS) * g + b


# ----- Pallas kernel: whole model, whole batch, single invocation -------------
def sas_model_kernel(x_ref, bias_ref, embt_ref,
                     wqkv_ref, wo_ref, w1_ref, w2_ref, vec_ref,
                     out_ref):
    x = x_ref[...].astype(jnp.float32)                      # (B*S, H)
    bias = bias_ref[...].astype(jnp.float32)                # (B, S, S) additive mask

    for l in range(L):                                       # static unroll over layers
        vec = vec_ref[l]                                     # (NVEC, VEC_W)
        ln1g, ln1b = vec[0:1, :H], vec[1:2, :H]
        bqkv = vec[2:3, :3 * D]                              # scale already folded into q part
        bo = vec[3:4, :H]
        ln2g, ln2b = vec[4:5, :H], vec[5:6, :H]
        b1 = vec[6:7, :FF]
        b2 = vec[7:8, :H]

        # --- self-attention sublayer (pre-LN); fused QKV projection ---
        h = _layer_norm(x, ln1g, ln1b)
        qkv = jnp.dot(h, wqkv_ref[l],
                      preferred_element_type=jnp.float32) + bqkv   # (BS, 3D)

        ctx_heads = []
        for hh in range(NH):                                 # static unroll over heads
            qh = qkv[:, hh * HS:(hh + 1) * HS].reshape(B, S, HS)
            kh = qkv[:, D + hh * HS:D + (hh + 1) * HS].reshape(B, S, HS)
            vh = qkv[:, 2 * D + hh * HS:2 * D + (hh + 1) * HS].reshape(B, S, HS)
            s = jnp.einsum('bqd,bkd->bqk', qh, kh,
                           preferred_element_type=jnp.float32) + bias
            s = s - jnp.max(s, axis=-1, keepdims=True)
            p = jnp.exp(s)
            inv = pl.reciprocal(jnp.sum(p, axis=-1, keepdims=True), approx=True)
            p = p * inv
            ctx_heads.append(
                jnp.einsum('bqk,bkd->bqd', p, vh,
                           preferred_element_type=jnp.float32).reshape(BS, HS))
        ctx = jnp.concatenate(ctx_heads, axis=-1)            # (BS, D)

        x = x + jnp.dot(ctx, wo_ref[l],
                        preferred_element_type=jnp.float32) + bo

        # --- position-wise feed-forward sublayer (pre-LN) ---
        h2 = _layer_norm(x, ln2g, ln2b)
        f = jnp.maximum(jnp.dot(h2, w1_ref[l],
                                preferred_element_type=jnp.float32) + b1, 0.0)
        x = x + jnp.dot(f, w2_ref[l],
                        preferred_element_type=jnp.float32) + b2

    # --- final scores = x @ embedding_weight.T (emb pre-transposed host-side) ---
    # (BS, V=128): lane-dense, unmasked stores.
    out_ref[...] = jnp.dot(x, embt_ref[...],
                           preferred_element_type=jnp.float32).astype(out_ref.dtype)


def sas_forward_pallas(x, mask, emb, params):
    (ln1g, ln1b, wq, bq, wk, bk, wv, bv, wo, bo,
     ln2g, ln2b, w1, b1, w2, b2) = params
    scale = 1.0 / math.sqrt(HS)

    # fuse QKV projections and fold the attention scale into the q columns
    wqkv = jnp.concatenate([wq * scale, wk, wv], axis=-1)            # (L, H, 3D)
    bqkv = jnp.concatenate([bq * scale, bk, bv], axis=-1)            # (L, 1, 3D)

    # pack all 1-row per-layer vectors into a single (L, NVEC, VEC_W) slab
    def pad(v):
        return jnp.pad(v, ((0, 0), (0, 0), (0, VEC_W - v.shape[-1])))
    vec = jnp.concatenate(
        [pad(ln1g), pad(ln1b), pad(bqkv), pad(bo),
         pad(ln2g), pad(ln2b), pad(b1), pad(b2)], axis=1)            # (L, 8, 128)

    emb_t = jnp.transpose(emb)                                       # (H, V)
    neg_bias = (1.0 - mask[:, 0].astype(jnp.float32)) * (-1e9)       # (B, S, S)
    x_flat = x.reshape(BS, H)                                        # free metadata reshape

    flops = (2 * BS * (L * (H * 3 * D + D * H + H * FF + FF * H) + H * V)
             + 2 * L * B * NH * 2 * S * S * HS)
    transcendentals = L * B * NH * S * S
    bytes_accessed = 4 * int(x_flat.size + neg_bias.size + emb_t.size + wqkv.size
                             + wo.size + w1.size + w2.size + vec.size + BS * V)

    # Single invocation (no grid): all operands map to full arrays in VMEM; the
    # whole workload fits easily and avoids any per-grid-step overhead.
    scores_flat = pl.pallas_call(
        sas_model_kernel,
        out_shape=jax.ShapeDtypeStruct((BS, V), jnp.float32),
        cost_estimate=pl.CostEstimate(flops=flops,
                                      transcendentals=transcendentals,
                                      bytes_accessed=bytes_accessed),
    )(x_flat, neg_bias, emb_t, wqkv, wo, w1, w2, vec)
    return scores_flat.reshape(B, S, V)


# ----- pure-JAX reference (same math, unfused params) for correctness ---------
def sas_forward_ref(x, mask, emb, params):
    (ln1g, ln1b, wq, bq, wk, bk, wv, bv, wo, bo,
     ln2g, ln2b, w1, b1, w2, b2) = params

    def ln(x, g, b):
        mu = jnp.mean(x, axis=-1, keepdims=True)
        var = jnp.mean((x - mu) ** 2, axis=-1, keepdims=True)
        return (x - mu) * jax.lax.rsqrt(var + EPS) * g + b

    keep = mask[:, 0].astype(jnp.float32)            # (B, S, S)
    neg_bias = (1.0 - keep) * (-1e9)
    scale = 1.0 / math.sqrt(HS)
    for l in range(L):
        h = ln(x, ln1g[l], ln1b[l])
        q = h @ wq[l] + bq[l]
        k = h @ wk[l] + bk[l]
        v = h @ wv[l] + bv[l]
        qh = q.reshape(B, S, NH, HS).transpose(0, 2, 1, 3)
        kh = k.reshape(B, S, NH, HS).transpose(0, 2, 1, 3)
        vh = v.reshape(B, S, NH, HS).transpose(0, 2, 1, 3)
        s = jnp.einsum("bhqd,bhkd->bhqk", qh, kh) * scale + neg_bias[:, None]
        p = jax.nn.softmax(s, axis=-1)
        ctx = jnp.einsum("bhqk,bhkd->bhqd", p, vh).transpose(0, 2, 1, 3).reshape(B, S, D)
        x = x + (ctx @ wo[l] + bo[l])
        h2 = ln(x, ln2g[l], ln2b[l])
        f = jnp.maximum(h2 @ w1[l] + b1[l], 0.0)
        x = x + (f @ w2[l] + b2[l])
    return x @ emb.T


if __name__ == "__main__":
    key = jax.random.PRNGKey(0)
    ks = jax.random.split(key, 12)

    def nrm(k, shape, scale=0.02):
        return jax.random.normal(k, shape, jnp.float32) * scale

    x = nrm(ks[0], (B, S, H), 1.0)
    emb = nrm(ks[1], (V, H), 0.1)
    # causal attention mask (1 = attend, 0 = masked), broadcast over heads
    mask = jnp.broadcast_to(jnp.tril(jnp.ones((S, S), jnp.float32)), (B, 1, S, S))

    params = (
        jnp.ones((L, 1, H), jnp.float32),            # ln1 gamma
        jnp.zeros((L, 1, H), jnp.float32),           # ln1 beta
        nrm(ks[2], (L, H, D)), jnp.zeros((L, 1, D), jnp.float32),   # Wq, bq
        nrm(ks[3], (L, H, D)), jnp.zeros((L, 1, D), jnp.float32),   # Wk, bk
        nrm(ks[4], (L, H, D)), jnp.zeros((L, 1, D), jnp.float32),   # Wv, bv
        nrm(ks[5], (L, D, H)), jnp.zeros((L, 1, H), jnp.float32),   # Wo, bo
        jnp.ones((L, 1, H), jnp.float32),            # ln2 gamma
        jnp.zeros((L, 1, H), jnp.float32),           # ln2 beta
        nrm(ks[6], (L, H, FF)), jnp.zeros((L, 1, FF), jnp.float32), # W1, b1
        nrm(ks[7], (L, FF, H)), jnp.zeros((L, 1, H), jnp.float32),  # W2, b2
    )

    scores = sas_forward_pallas(x, mask, emb, params)
    jax.block_until_ready(scores)

    ref = sas_forward_ref(x, mask, emb, params)
    np.testing.assert_allclose(np.asarray(scores), np.asarray(ref),
                               rtol=2e-3, atol=2e-3)
    print("KERNEL_OK")
</pallas_src>

<mosaic_0001>
module attributes {stable_mosaic.version = 11 : i64} {
  func.func @sas_model_kernel(%arg0: memref<16x32xf32, #tpu.memory_space<vmem>>, %arg1: memref<2x8x8xf32, #tpu.memory_space<vmem>>, %arg2: memref<32x128xf32, #tpu.memory_space<vmem>>, %arg3: memref<2x32x96xf32, #tpu.memory_space<vmem>>, %arg4: memref<2x32x32xf32, #tpu.memory_space<vmem>>, %arg5: memref<2x32x128xf32, #tpu.memory_space<vmem>>, %arg6: memref<2x128x32xf32, #tpu.memory_space<vmem>>, %arg7: memref<2x8x128xf32, #tpu.memory_space<vmem>>, %arg8: memref<16x128xf32, #tpu.memory_space<vmem>>) attributes {dimension_semantics = [], scalar_prefetch = 0 : i64, scratch_operands = 0 : i64, tpu.core_type = #tpu.core_type<tc>} {
    %c0 = arith.constant 0 : index
    %c0_0 = arith.constant 0 : index
    %0 = vector.load %arg0[%c0, %c0_0] : memref<16x32xf32, #tpu.memory_space<vmem>>, vector<16x32xf32>
    %c0_1 = arith.constant 0 : index
    %c0_2 = arith.constant 0 : index
    %c0_3 = arith.constant 0 : index
    %1 = vector.load %arg1[%c0_1, %c0_2, %c0_3] : memref<2x8x8xf32, #tpu.memory_space<vmem>>, vector<2x8x8xf32>
    %c0_4 = arith.constant 0 : index
    %c0_5 = arith.constant 0 : index
    %c0_6 = arith.constant 0 : index
    %2 = vector.load %arg7[%c0_4, %c0_5, %c0_6] : memref<2x8x128xf32, #tpu.memory_space<vmem>>, vector<1x8x128xf32>
    %3 = vector.shape_cast %2 : vector<1x8x128xf32> to vector<8x128xf32>
    %4 = vector.extract_strided_slice %3 {offsets = [0, 0], sizes = [1, 32], strides = [1, 1]} : vector<8x128xf32> to vector<1x32xf32>
    %5 = vector.extract_strided_slice %3 {offsets = [1, 0], sizes = [1, 32], strides = [1, 1]} : vector<8x128xf32> to vector<1x32xf32>
    %6 = vector.extract_strided_slice %3 {offsets = [2, 0], sizes = [1, 96], strides = [1, 1]} : vector<8x128xf32> to vector<1x96xf32>
    %7 = vector.extract_strided_slice %3 {offsets = [3, 0], sizes = [1, 32], strides = [1, 1]} : vector<8x128xf32> to vector<1x32xf32>
    %8 = vector.extract_strided_slice %3 {offsets = [4, 0], sizes = [1, 32], strides = [1, 1]} : vector<8x128xf32> to vector<1x32xf32>
    %9 = vector.extract_strided_slice %3 {offsets = [5, 0], sizes = [1, 32], strides = [1, 1]} : vector<8x128xf32> to vector<1x32xf32>
    %10 = vector.extract_strided_slice %3 {offsets = [6, 0], sizes = [1, 128], strides = [1, 1]} : vector<8x128xf32> to vector<1x128xf32>
    %11 = vector.extract_strided_slice %3 {offsets = [7, 0], sizes = [1, 32], strides = [1, 1]} : vector<8x128xf32> to vector<1x32xf32>
    %cst = arith.constant dense<0.000000e+00> : vector<16xf32>
    %12 = vector.multi_reduction <add>, %0, %cst [1] : vector<16x32xf32> to vector<16xf32>
    %13 = vector.shape_cast %12 : vector<16xf32> to vector<16x1xf32>
    %cst_7 = arith.constant 3.200000e+01 : f32
    %14 = vector.broadcast %cst_7 : f32 to vector<16x1xf32>
    %15 = arith.divf %13, %14 : vector<16x1xf32>
    %16 = arith.mulf %0, %0 : vector<16x32xf32>
    %cst_8 = arith.constant dense<0.000000e+00> : vector<16xf32>
    %17 = vector.multi_reduction <add>, %16, %cst_8 [1] : vector<16x32xf32> to vector<16xf32>
    %18 = vector.shape_cast %17 : vector<16xf32> to vector<16x1xf32>
    %cst_9 = arith.constant 3.200000e+01 : f32
    %19 = vector.broadcast %cst_9 : f32 to vector<16x1xf32>
    %20 = arith.divf %18, %19 : vector<16x1xf32>
    %21 = arith.mulf %15, %15 : vector<16x1xf32>
    %22 = arith.subf %20, %21 : vector<16x1xf32>
    %cst_10 = arith.constant 0.000000e+00 : f32
    %23 = vector.broadcast %cst_10 : f32 to vector<16x1xf32>
    %24 = arith.maximumf %22, %23 : vector<16x1xf32>
    %25 = vector.broadcast %15 : vector<16x1xf32> to vector<16x32xf32>
    %26 = arith.subf %0, %25 : vector<16x32xf32>
    %cst_11 = arith.constant 9.99999974E-6 : f32
    %27 = vector.broadcast %cst_11 : f32 to vector<16x1xf32>
    %28 = arith.addf %24, %27 : vector<16x1xf32>
    %29 = math.rsqrt %28 : vector<16x1xf32>
    %30 = vector.broadcast %29 : vector<16x1xf32> to vector<16x32xf32>
    %31 = arith.mulf %26, %30 : vector<16x32xf32>
    %32 = vector.broadcast %4 : vector<1x32xf32> to vector<16x32xf32>
    %33 = arith.mulf %31, %32 : vector<16x32xf32>
    %34 = vector.broadcast %5 : vector<1x32xf32> to vector<16x32xf32>
    %35 = arith.addf %33, %34 : vector<16x32xf32>
    %c0_12 = arith.constant 0 : index
    %c0_13 = arith.constant 0 : index
    %c0_14 = arith.constant 0 : index
    %36 = vector.load %arg3[%c0_12, %c0_13, %c0_14] : memref<2x32x96xf32, #tpu.memory_space<vmem>>, vector<1x32x96xf32>
    %37 = vector.shape_cast %36 : vector<1x32x96xf32> to vector<32x96xf32>
    %cst_15 = arith.constant dense<0.000000e+00> : vector<16x96xf32>
    %38 = tpu.matmul %35, %37, %cst_15 {dimension_numbers = #tpu.dot_dimension_numbers<[1], [0], [0], [1], [0, 0, 1, 1], [], []>} : vector<16x32xf32>, vector<32x96xf32>, vector<16x96xf32> -> vector<16x96xf32>
    %39 = vector.broadcast %6 : vector<1x96xf32> to vector<16x96xf32>
    %40 = arith.addf %38, %39 : vector<16x96xf32>
    %41 = vector.extract_strided_slice %40 {offsets = [0, 0], sizes = [16, 16], strides = [1, 1]} : vector<16x96xf32> to vector<16x16xf32>
    %42 = vector.shape_cast %41 : vector<16x16xf32> to vector<2x8x16xf32>
    %43 = vector.extract_strided_slice %40 {offsets = [0, 32], sizes = [16, 16], strides = [1, 1]} : vector<16x96xf32> to vector<16x16xf32>
    %44 = vector.shape_cast %43 : vector<16x16xf32> to vector<2x8x16xf32>
    %45 = vector.extract_strided_slice %40 {offsets = [0, 64], sizes = [16, 16], strides = [1, 1]} : vector<16x96xf32> to vector<16x16xf32>
    %46 = vector.shape_cast %45 : vector<16x16xf32> to vector<2x8x16xf32>
    "tpu.trace_start"() <{level = 10 : i32, message = "bqd,bkd->bqk"}> : () -> ()
    %cst_16 = arith.constant dense<0.000000e+00> : vector<2x8x8xf32>
    %47 = tpu.matmul %42, %44, %cst_16 {dimension_numbers = #tpu.dot_dimension_numbers<[2], [2], [1], [1], [0, 0, 0, 1, 1, 1], [0], [0]>} : vector<2x8x16xf32>, vector<2x8x16xf32>, vector<2x8x8xf32> -> vector<2x8x8xf32>
    "tpu.trace_stop"() : () -> ()
    %48 = arith.addf %47, %1 : vector<2x8x8xf32>
    %cst_17 = arith.constant dense<0xFF800000> : vector<2x8xf32>
    %49 = vector.multi_reduction <maximumf>, %48, %cst_17 [2] : vector<2x8x8xf32> to vector<2x8xf32>
    %50 = vector.shape_cast %49 : vector<2x8xf32> to vector<2x8x1xf32>
    %51 = vector.broadcast %50 : vector<2x8x1xf32> to vector<2x8x8xf32>
    %52 = arith.subf %48, %51 : vector<2x8x8xf32>
    %53 = math.exp %52 : vector<2x8x8xf32>
    %cst_18 = arith.constant dense<0.000000e+00> : vector<2x8xf32>
    %54 = vector.multi_reduction <add>, %53, %cst_18 [2] : vector<2x8x8xf32> to vector<2x8xf32>
    %55 = vector.shape_cast %54 : vector<2x8xf32> to vector<2x8x1xf32>
    %56 = tpu.reciprocal %55 {approx = true} : vector<2x8x1xf32> -> vector<2x8x1xf32>
    %57 = vector.broadcast %56 : vector<2x8x1xf32> to vector<2x8x8xf32>
    %58 = arith.mulf %53, %57 : vector<2x8x8xf32>
    "tpu.trace_start"() <{level = 10 : i32, message = "bqk,bkd->bqd"}> : () -> ()
    %cst_19 = arith.constant dense<0.000000e+00> : vector<2x8x16xf32>
    %59 = tpu.matmul %58, %46, %cst_19 {dimension_numbers = #tpu.dot_dimension_numbers<[2], [1], [1], [2], [0, 0, 0, 1, 1, 2], [0], [0]>} : vector<2x8x8xf32>, vector<2x8x16xf32>, vector<2x8x16xf32> -> vector<2x8x16xf32>
    "tpu.trace_stop"() : () -> ()
    %60 = vector.shape_cast %59 : vector<2x8x16xf32> to vector<16x16xf32>
    %61 = vector.extract_strided_slice %40 {offsets = [0, 16], sizes = [16, 16], strides = [1, 1]} : vector<16x96xf32> to vector<16x16xf32>
    %62 = vector.shape_cast %61 : vector<16x16xf32> to vector<2x8x16xf32>
    %63 = vector.extract_strided_slice %40 {offsets = [0, 48], sizes = [16, 16], strides = [1, 1]} : vector<16x96xf32> to vector<16x16xf32>
    %64 = vector.shape_cast %63 : vector<16x16xf32> to vector<2x8x16xf32>
    %65 = vector.extract_strided_slice %40 {offsets = [0, 80], sizes = [16, 16], strides = [1, 1]} : vector<16x96xf32> to vector<16x16xf32>
    %66 = vector.shape_cast %65 : vector<16x16xf32> to vector<2x8x16xf32>
    "tpu.trace_start"() <{level = 10 : i32, message = "bqd,bkd->bqk"}> : () -> ()
    %cst_20 = arith.constant dense<0.000000e+00> : vector<2x8x8xf32>
    %67 = tpu.matmul %62, %64, %cst_20 {dimension_numbers = #tpu.dot_dimension_numbers<[2], [2], [1], [1], [0, 0, 0, 1, 1, 1], [0], [0]>} : vector<2x8x16xf32>, vector<2x8x16xf32>, vector<2x8x8xf32> -> vector<2x8x8xf32>
    "tpu.trace_stop"() : () -> ()
    %68 = arith.addf %67, %1 : vector<2x8x8xf32>
    %cst_21 = arith.constant dense<0xFF800000> : vector<2x8xf32>
    %69 = vector.multi_reduction <maximumf>, %68, %cst_21 [2] : vector<2x8x8xf32> to vector<2x8xf32>
    %70 = vector.shape_cast %69 : vector<2x8xf32> to vector<2x8x1xf32>
    %71 = vector.broadcast %70 : vector<2x8x1xf32> to vector<2x8x8xf32>
    %72 = arith.subf %68, %71 : vector<2x8x8xf32>
    %73 = math.exp %72 : vector<2x8x8xf32>
    %cst_22 = arith.constant dense<0.000000e+00> : vector<2x8xf32>
    %74 = vector.multi_reduction <add>, %73, %cst_22 [2] : vector<2x8x8xf32> to vector<2x8xf32>
    %75 = vector.shape_cast %74 : vector<2x8xf32> to vector<2x8x1xf32>
    %76 = tpu.reciprocal %75 {approx = true} : vector<2x8x1xf32> -> vector<2x8x1xf32>
    %77 = vector.broadcast %76 : vector<2x8x1xf32> to vector<2x8x8xf32>
    %78 = arith.mulf %73, %77 : vector<2x8x8xf32>
    "tpu.trace_start"() <{level = 10 : i32, message = "bqk,bkd->bqd"}> : () -> ()
    %cst_23 = arith.constant dense<0.000000e+00> : vector<2x8x16xf32>
    %79 = tpu.matmul %78, %66, %cst_23 {dimension_numbers = #tpu.dot_dimension_numbers<[2], [1], [1], [2], [0, 0, 0, 1, 1, 2], [0], [0]>} : vector<2x8x8xf32>, vector<2x8x16xf32>, vector<2x8x16xf32> -> vector<2x8x16xf32>
    "tpu.trace_stop"() : () -> ()
    %80 = vector.shape_cast %79 : vector<2x8x16xf32> to vector<16x16xf32>
    %81 = tpu.concatenate %60, %80 in 1 : vector<16x16xf32>, vector<16x16xf32> -> vector<16x32xf32>
    %c0_24 = arith.constant 0 : index
    %c0_25 = arith.constant 0 : index
    %c0_26 = arith.constant 0 : index
    %82 = vector.load %arg4[%c0_24, %c0_25, %c0_26] : memref<2x32x32xf32, #tpu.memory_space<vmem>>, vector<1x32x32xf32>
    %83 = vector.shape_cast %82 : vector<1x32x32xf32> to vector<32x32xf32>
    %cst_27 = arith.constant dense<0.000000e+00> : vector<16x32xf32>
    %84 = tpu.matmul %81, %83, %cst_27 {dimension_numbers = #tpu.dot_dimension_numbers<[1], [0], [0], [1], [0, 0, 1, 1], [], []>} : vector<16x32xf32>, vector<32x32xf32>, vector<16x32xf32> -> vector<16x32xf32>
    %85 = arith.addf %0, %84 : vector<16x32xf32>
    %86 = vector.broadcast %7 : vector<1x32xf32> to vector<16x32xf32>
    %87 = arith.addf %85, %86 : vector<16x32xf32>
    %cst_28 = arith.constant dense<0.000000e+00> : vector<16xf32>
    %88 = vector.multi_reduction <add>, %87, %cst_28 [1] : vector<16x32xf32> to vector<16xf32>
    %89 = vector.shape_cast %88 : vector<16xf32> to vector<16x1xf32>
    %cst_29 = arith.constant 3.200000e+01 : f32
    %90 = vector.broadcast %cst_29 : f32 to vector<16x1xf32>
    %91 = arith.divf %89, %90 : vector<16x1xf32>
    %92 = arith.mulf %87, %87 : vector<16x32xf32>
    %cst_30 = arith.constant dense<0.000000e+00> : vector<16xf32>
    %93 = vector.multi_reduction <add>, %92, %cst_30 [1] : vector<16x32xf32> to vector<16xf32>
    %94 = vector.shape_cast %93 : vector<16xf32> to vector<16x1xf32>
    %cst_31 = arith.constant 3.200000e+01 : f32
    %95 = vector.broadcast %cst_31 : f32 to vector<16x1xf32>
    %96 = arith.divf %94, %95 : vector<16x1xf32>
    %97 = arith.mulf %91, %91 : vector<16x1xf32>
    %98 = arith.subf %96, %97 : vector<16x1xf32>
    %cst_32 = arith.constant 0.000000e+00 : f32
    %99 = vector.broadcast %cst_32 : f32 to vector<16x1xf32>
    %100 = arith.maximumf %98, %99 : vector<16x1xf32>
    %101 = vector.broadcast %91 : vector<16x1xf32> to vector<16x32xf32>
    %102 = arith.subf %87, %101 : vector<16x32xf32>
    %cst_33 = arith.constant 9.99999974E-6 : f32
    %103 = vector.broadcast %cst_33 : f32 to vector<16x1xf32>
    %104 = arith.addf %100, %103 : vector<16x1xf32>
    %105 = math.rsqrt %104 : vector<16x1xf32>
    %106 = vector.broadcast %105 : vector<16x1xf32> to vector<16x32xf32>
    %107 = arith.mulf %102, %106 : vector<16x32xf32>
    %108 = vector.broadcast %8 : vector<1x32xf32> to vector<16x32xf32>
    %109 = arith.mulf %107, %108 : vector<16x32xf32>
    %110 = vector.broadcast %9 : vector<1x32xf32> to vector<16x32xf32>
    %111 = arith.addf %109, %110 : vector<16x32xf32>
    %c0_34 = arith.constant 0 : index
    %c0_35 = arith.constant 0 : index
    %c0_36 = arith.constant 0 : index
    %112 = vector.load %arg5[%c0_34, %c0_35, %c0_36] : memref<2x32x128xf32, #tpu.memory_space<vmem>>, vector<1x32x128xf32>
    %113 = vector.shape_cast %112 : vector<1x32x128xf32> to vector<32x128xf32>
    %cst_37 = arith.constant dense<0.000000e+00> : vector<16x128xf32>
    %114 = tpu.matmul %111, %113, %cst_37 {dimension_numbers = #tpu.dot_dimension_numbers<[1], [0], [0], [1], [0, 0, 1, 1], [], []>} : vector<16x32xf32>, vector<32x128xf32>, vector<16x128xf32> -> vector<16x128xf32>
    %115 = vector.broadcast %10 : vector<1x128xf32> to vector<16x128xf32>
    %116 = arith.addf %114, %115 : vector<16x128xf32>
    %cst_38 = arith.constant 0.000000e+00 : f32
    %117 = vector.broadcast %cst_38 : f32 to vector<16x128xf32>
    %118 = arith.maximumf %116, %117 : vector<16x128xf32>
    %c0_39 = arith.constant 0 : index
    %c0_40 = arith.constant 0 : index
    %c0_41 = arith.constant 0 : index
    %119 = vector.load %arg6[%c0_39, %c0_40, %c0_41] : memref<2x128x32xf32, #tpu.memory_space<vmem>>, vector<1x128x32xf32>
    %120 = vector.shape_cast %119 : vector<1x128x32xf32> to vector<128x32xf32>
    %cst_42 = arith.constant dense<0.000000e+00> : vector<16x32xf32>
    %121 = tpu.matmul %118, %120, %cst_42 {dimension_numbers = #tpu.dot_dimension_numbers<[1], [0], [0], [1], [0, 0, 1, 1], [], []>} : vector<16x128xf32>, vector<128x32xf32>, vector<16x32xf32> -> vector<16x32xf32>
    %122 = arith.addf %87, %121 : vector<16x32xf32>
    %123 = vector.broadcast %11 : vector<1x32xf32> to vector<16x32xf32>
    %124 = arith.addf %122, %123 : vector<16x32xf32>
    %c1 = arith.constant 1 : index
    %c0_43 = arith.constant 0 : index
    %c0_44 = arith.constant 0 : index
    %125 = vector.load %arg7[%c1, %c0_43, %c0_44] : memref<2x8x128xf32, #tpu.memory_space<vmem>>, vector<1x8x128xf32>
    %126 = vector.shape_cast %125 : vector<1x8x128xf32> to vector<8x128xf32>
    %127 = vector.extract_strided_slice %126 {offsets = [0, 0], sizes = [1, 32], strides = [1, 1]} : vector<8x128xf32> to vector<1x32xf32>
    %128 = vector.extract_strided_slice %126 {offsets = [1, 0], sizes = [1, 32], strides = [1, 1]} : vector<8x128xf32> to vector<1x32xf32>
    %129 = vector.extract_strided_slice %126 {offsets = [2, 0], sizes = [1, 96], strides = [1, 1]} : vector<8x128xf32> to vector<1x96xf32>
    %130 = vector.extract_strided_slice %126 {offsets = [3, 0], sizes = [1, 32], strides = [1, 1]} : vector<8x128xf32> to vector<1x32xf32>
    %131 = vector.extract_strided_slice %126 {offsets = [4, 0], sizes = [1, 32], strides = [1, 1]} : vector<8x128xf32> to vector<1x32xf32>
    %132 = vector.extract_strided_slice %126 {offsets = [5, 0], sizes = [1, 32], strides = [1, 1]} : vector<8x128xf32> to vector<1x32xf32>
    %133 = vector.extract_strided_slice %126 {offsets = [6, 0], sizes = [1, 128], strides = [1, 1]} : vector<8x128xf32> to vector<1x128xf32>
    %134 = vector.extract_strided_slice %126 {offsets = [7, 0], sizes = [1, 32], strides = [1, 1]} : vector<8x128xf32> to vector<1x32xf32>
    %cst_45 = arith.constant dense<0.000000e+00> : vector<16xf32>
    %135 = vector.multi_reduction <add>, %124, %cst_45 [1] : vector<16x32xf32> to vector<16xf32>
    %136 = vector.shape_cast %135 : vector<16xf32> to vector<16x1xf32>
    %cst_46 = arith.constant 3.200000e+01 : f32
    %137 = vector.broadcast %cst_46 : f32 to vector<16x1xf32>
    %138 = arith.divf %136, %137 : vector<16x1xf32>
    %139 = arith.mulf %124, %124 : vector<16x32xf32>
    %cst_47 = arith.constant dense<0.000000e+00> : vector<16xf32>
    %140 = vector.multi_reduction <add>, %139, %cst_47 [1] : vector<16x32xf32> to vector<16xf32>
    %141 = vector.shape_cast %140 : vector<16xf32> to vector<16x1xf32>
    %cst_48 = arith.constant 3.200000e+01 : f32
    %142 = vector.broadcast %cst_48 : f32 to vector<16x1xf32>
    %143 = arith.divf %141, %142 : vector<16x1xf32>
    %144 = arith.mulf %138, %138 : vector<16x1xf32>
    %145 = arith.subf %143, %144 : vector<16x1xf32>
    %cst_49 = arith.constant 0.000000e+00 : f32
    %146 = vector.broadcast %cst_49 : f32 to vector<16x1xf32>
    %147 = arith.maximumf %145, %146 : vector<16x1xf32>
    %148 = vector.broadcast %138 : vector<16x1xf32> to vector<16x32xf32>
    %149 = arith.subf %124, %148 : vector<16x32xf32>
    %cst_50 = arith.constant 9.99999974E-6 : f32
    %150 = vector.broadcast %cst_50 : f32 to vector<16x1xf32>
    %151 = arith.addf %147, %150 : vector<16x1xf32>
    %152 = math.rsqrt %151 : vector<16x1xf32>
    %153 = vector.broadcast %152 : vector<16x1xf32> to vector<16x32xf32>
    %154 = arith.mulf %149, %153 : vector<16x32xf32>
    %155 = vector.broadcast %127 : vector<1x32xf32> to vector<16x32xf32>
    %156 = arith.mulf %154, %155 : vector<16x32xf32>
    %157 = vector.broadcast %128 : vector<1x32xf32> to vector<16x32xf32>
    %158 = arith.addf %156, %157 : vector<16x32xf32>
    %c1_51 = arith.constant 1 : index
    %c0_52 = arith.constant 0 : index
    %c0_53 = arith.constant 0 : index
    %159 = vector.load %arg3[%c1_51, %c0_52, %c0_53] : memref<2x32x96xf32, #tpu.memory_space<vmem>>, vector<1x32x96xf32>
    %160 = vector.shape_cast %159 : vector<1x32x96xf32> to vector<32x96xf32>
    %cst_54 = arith.constant dense<0.000000e+00> : vector<16x96xf32>
    %161 = tpu.matmul %158, %160, %cst_54 {dimension_numbers = #tpu.dot_dimension_numbers<[1], [0], [0], [1], [0, 0, 1, 1], [], []>} : vector<16x32xf32>, vector<32x96xf32>, vector<16x96xf32> -> vector<16x96xf32>
    %162 = vector.broadcast %129 : vector<1x96xf32> to vector<16x96xf32>
    %163 = arith.addf %161, %162 : vector<16x96xf32>
    %164 = vector.extract_strided_slice %163 {offsets = [0, 0], sizes = [16, 16], strides = [1, 1]} : vector<16x96xf32> to vector<16x16xf32>
    %165 = vector.shape_cast %164 : vector<16x16xf32> to vector<2x8x16xf32>
    %166 = vector.extract_strided_slice %163 {offsets = [0, 32], sizes = [16, 16], strides = [1, 1]} : vector<16x96xf32> to vector<16x16xf32>
    %167 = vector.shape_cast %166 : vector<16x16xf32> to vector<2x8x16xf32>
    %168 = vector.extract_strided_slice %163 {offsets = [0, 64], sizes = [16, 16], strides = [1, 1]} : vector<16x96xf32> to vector<16x16xf32>
    %169 = vector.shape_cast %168 : vector<16x16xf32> to vector<2x8x16xf32>
    "tpu.trace_start"() <{level = 10 : i32, message = "bqd,bkd->bqk"}> : () -> ()
    %cst_55 = arith.constant dense<0.000000e+00> : vector<2x8x8xf32>
    %170 = tpu.matmul %165, %167, %cst_55 {dimension_numbers = #tpu.dot_dimension_numbers<[2], [2], [1], [1], [0, 0, 0, 1, 1, 1], [0], [0]>} : vector<2x8x16xf32>, vector<2x8x16xf32>, vector<2x8x8xf32> -> vector<2x8x8xf32>
    "tpu.trace_stop"() : () -> ()
    %171 = arith.addf %170, %1 : vector<2x8x8xf32>
    %cst_56 = arith.constant dense<0xFF800000> : vector<2x8xf32>
    %172 = vector.multi_reduction <maximumf>, %171, %cst_56 [2] : vector<2x8x8xf32> to vector<2x8xf32>
    %173 = vector.shape_cast %172 : vector<2x8xf32> to vector<2x8x1xf32>
    %174 = vector.broadcast %173 : vector<2x8x1xf32> to vector<2x8x8xf32>
    %175 = arith.subf %171, %174 : vector<2x8x8xf32>
    %176 = math.exp %175 : vector<2x8x8xf32>
    %cst_57 = arith.constant dense<0.000000e+00> : vector<2x8xf32>
    %177 = vector.multi_reduction <add>, %176, %cst_57 [2] : vector<2x8x8xf32> to vector<2x8xf32>
    %178 = vector.shape_cast %177 : vector<2x8xf32> to vector<2x8x1xf32>
    %179 = tpu.reciprocal %178 {approx = true} : vector<2x8x1xf32> -> vector<2x8x1xf32>
    %180 = vector.broadcast %179 : vector<2x8x1xf32> to vector<2x8x8xf32>
    %181 = arith.mulf %176, %180 : vector<2x8x8xf32>
    "tpu.trace_start"() <{level = 10 : i32, message = "bqk,bkd->bqd"}> : () -> ()
    %cst_58 = arith.constant dense<0.000000e+00> : vector<2x8x16xf32>
    %182 = tpu.matmul %181, %169, %cst_58 {dimension_numbers = #tpu.dot_dimension_numbers<[2], [1], [1], [2], [0, 0, 0, 1, 1, 2], [0], [0]>} : vector<2x8x8xf32>, vector<2x8x16xf32>, vector<2x8x16xf32> -> vector<2x8x16xf32>
    "tpu.trace_stop"() : () -> ()
    %183 = vector.shape_cast %182 : vector<2x8x16xf32> to vector<16x16xf32>
    %184 = vector.extract_strided_slice %163 {offsets = [0, 16], sizes = [16, 16], strides = [1, 1]} : vector<16x96xf32> to vector<16x16xf32>
    %185 = vector.shape_cast %184 : vector<16x16xf32> to vector<2x8x16xf32>
    %186 = vector.extract_strided_slice %163 {offsets = [0, 48], sizes = [16, 16], strides = [1, 1]} : vector<16x96xf32> to vector<16x16xf32>
    %187 = vector.shape_cast %186 : vector<16x16xf32> to vector<2x8x16xf32>
    %188 = vector.extract_strided_slice %163 {offsets = [0, 80], sizes = [16, 16], strides = [1, 1]} : vector<16x96xf32> to vector<16x16xf32>
    %189 = vector.shape_cast %188 : vector<16x16xf32> to vector<2x8x16xf32>
    "tpu.trace_start"() <{level = 10 : i32, message = "bqd,bkd->bqk"}> : () -> ()
    %cst_59 = arith.constant dense<0.000000e+00> : vector<2x8x8xf32>
    %190 = tpu.matmul %185, %187, %cst_59 {dimension_numbers = #tpu.dot_dimension_numbers<[2], [2], [1], [1], [0, 0, 0, 1, 1, 1], [0], [0]>} : vector<2x8x16xf32>, vector<2x8x16xf32>, vector<2x8x8xf32> -> vector<2x8x8xf32>
    "tpu.trace_stop"() : () -> ()
    %191 = arith.addf %190, %1 : vector<2x8x8xf32>
    %cst_60 = arith.constant dense<0xFF800000> : vector<2x8xf32>
    %192 = vector.multi_reduction <maximumf>, %191, %cst_60 [2] : vector<2x8x8xf32> to vector<2x8xf32>
    %193 = vector.shape_cast %192 : vector<2x8xf32> to vector<2x8x1xf32>
    %194 = vector.broadcast %193 : vector<2x8x1xf32> to vector<2x8x8xf32>
    %195 = arith.subf %191, %194 : vector<2x8x8xf32>
    %196 = math.exp %195 : vector<2x8x8xf32>
    %cst_61 = arith.constant dense<0.000000e+00> : vector<2x8xf32>
    %197 = vector.multi_reduction <add>, %196, %cst_61 [2] : vector<2x8x8xf32> to vector<2x8xf32>
    %198 = vector.shape_cast %197 : vector<2x8xf32> to vector<2x8x1xf32>
    %199 = tpu.reciprocal %198 {approx = true} : vector<2x8x1xf32> -> vector<2x8x1xf32>
    %200 = vector.broadcast %199 : vector<2x8x1xf32> to vector<2x8x8xf32>
    %201 = arith.mulf %196, %200 : vector<2x8x8xf32>
    "tpu.trace_start"() <{level = 10 : i32, message = "bqk,bkd->bqd"}> : () -> ()
    %cst_62 = arith.constant dense<0.000000e+00> : vector<2x8x16xf32>
    %202 = tpu.matmul %201, %189, %cst_62 {dimension_numbers = #tpu.dot_dimension_numbers<[2], [1], [1], [2], [0, 0, 0, 1, 1, 2], [0], [0]>} : vector<2x8x8xf32>, vector<2x8x16xf32>, vector<2x8x16xf32> -> vector<2x8x16xf32>
    "tpu.trace_stop"() : () -> ()
    %203 = vector.shape_cast %202 : vector<2x8x16xf32> to vector<16x16xf32>
    %204 = tpu.concatenate %183, %203 in 1 : vector<16x16xf32>, vector<16x16xf32> -> vector<16x32xf32>
    %c1_63 = arith.constant 1 : index
    %c0_64 = arith.constant 0 : index
    %c0_65 = arith.constant 0 : index
    %205 = vector.load %arg4[%c1_63, %c0_64, %c0_65] : memref<2x32x32xf32, #tpu.memory_space<vmem>>, vector<1x32x32xf32>
    %206 = vector.shape_cast %205 : vector<1x32x32xf32> to vector<32x32xf32>
    %cst_66 = arith.constant dense<0.000000e+00> : vector<16x32xf32>
    %207 = tpu.matmul %204, %206, %cst_66 {dimension_numbers = #tpu.dot_dimension_numbers<[1], [0], [0], [1], [0, 0, 1, 1], [], []>} : vector<16x32xf32>, vector<32x32xf32>, vector<16x32xf32> -> vector<16x32xf32>
    %208 = arith.addf %124, %207 : vector<16x32xf32>
    %209 = vector.broadcast %130 : vector<1x32xf32> to vector<16x32xf32>
    %210 = arith.addf %208, %209 : vector<16x32xf32>
    %cst_67 = arith.constant dense<0.000000e+00> : vector<16xf32>
    %211 = vector.multi_reduction <add>, %210, %cst_67 [1] : vector<16x32xf32> to vector<16xf32>
    %212 = vector.shape_cast %211 : vector<16xf32> to vector<16x1xf32>
    %cst_68 = arith.constant 3.200000e+01 : f32
    %213 = vector.broadcast %cst_68 : f32 to vector<16x1xf32>
    %214 = arith.divf %212, %213 : vector<16x1xf32>
    %215 = arith.mulf %210, %210 : vector<16x32xf32>
    %cst_69 = arith.constant dense<0.000000e+00> : vector<16xf32>
    %216 = vector.multi_reduction <add>, %215, %cst_69 [1] : vector<16x32xf32> to vector<16xf32>
    %217 = vector.shape_cast %216 : vector<16xf32> to vector<16x1xf32>
    %cst_70 = arith.constant 3.200000e+01 : f32
    %218 = vector.broadcast %cst_70 : f32 to vector<16x1xf32>
    %219 = arith.divf %217, %218 : vector<16x1xf32>
    %220 = arith.mulf %214, %214 : vector<16x1xf32>
    %221 = arith.subf %219, %220 : vector<16x1xf32>
    %cst_71 = arith.constant 0.000000e+00 : f32
    %222 = vector.broadcast %cst_71 : f32 to vector<16x1xf32>
    %223 = arith.maximumf %221, %222 : vector<16x1xf32>
    %224 = vector.broadcast %214 : vector<16x1xf32> to vector<16x32xf32>
    %225 = arith.subf %210, %224 : vector<16x32xf32>
    %cst_72 = arith.constant 9.99999974E-6 : f32
    %226 = vector.broadcast %cst_72 : f32 to vector<16x1xf32>
    %227 = arith.addf %223, %226 : vector<16x1xf32>
    %228 = math.rsqrt %227 : vector<16x1xf32>
    %229 = vector.broadcast %228 : vector<16x1xf32> to vector<16x32xf32>
    %230 = arith.mulf %225, %229 : vector<16x32xf32>
    %231 = vector.broadcast %131 : vector<1x32xf32> to vector<16x32xf32>
    %232 = arith.mulf %230, %231 : vector<16x32xf32>
    %233 = vector.broadcast %132 : vector<1x32xf32> to vector<16x32xf32>
    %234 = arith.addf %232, %233 : vector<16x32xf32>
    %c1_73 = arith.constant 1 : index
    %c0_74 = arith.constant 0 : index
    %c0_75 = arith.constant 0 : index
    %235 = vector.load %arg5[%c1_73, %c0_74, %c0_75] : memref<2x32x128xf32, #tpu.memory_space<vmem>>, vector<1x32x128xf32>
    %236 = vector.shape_cast %235 : vector<1x32x128xf32> to vector<32x128xf32>
    %cst_76 = arith.constant dense<0.000000e+00> : vector<16x128xf32>
    %237 = tpu.matmul %234, %236, %cst_76 {dimension_numbers = #tpu.dot_dimension_numbers<[1], [0], [0], [1], [0, 0, 1, 1], [], []>} : vector<16x32xf32>, vector<32x128xf32>, vector<16x128xf32> -> vector<16x128xf32>
    %238 = vector.broadcast %133 : vector<1x128xf32> to vector<16x128xf32>
    %239 = arith.addf %237, %238 : vector<16x128xf32>
    %cst_77 = arith.constant 0.000000e+00 : f32
    %240 = vector.broadcast %cst_77 : f32 to vector<16x128xf32>
    %241 = arith.maximumf %239, %240 : vector<16x128xf32>
    %c1_78 = arith.constant 1 : index
    %c0_79 = arith.constant 0 : index
    %c0_80 = arith.constant 0 : index
    %242 = vector.load %arg6[%c1_78, %c0_79, %c0_80] : memref<2x128x32xf32, #tpu.memory_space<vmem>>, vector<1x128x32xf32>
    %243 = vector.shape_cast %242 : vector<1x128x32xf32> to vector<128x32xf32>
    %cst_81 = arith.constant dense<0.000000e+00> : vector<16x32xf32>
    %244 = tpu.matmul %241, %243, %cst_81 {dimension_numbers = #tpu.dot_dimension_numbers<[1], [0], [0], [1], [0, 0, 1, 1], [], []>} : vector<16x128xf32>, vector<128x32xf32>, vector<16x32xf32> -> vector<16x32xf32>
    %245 = arith.addf %210, %244 : vector<16x32xf32>
    %246 = vector.broadcast %134 : vector<1x32xf32> to vector<16x32xf32>
    %247 = arith.addf %245, %246 : vector<16x32xf32>
    %c0_82 = arith.constant 0 : index
    %c0_83 = arith.constant 0 : index
    %248 = vector.load %arg2[%c0_82, %c0_83] : memref<32x128xf32, #tpu.memory_space<vmem>>, vector<32x128xf32>
    %cst_84 = arith.constant dense<0.000000e+00> : vector<16x128xf32>
    %249 = tpu.matmul %247, %248, %cst_84 {dimension_numbers = #tpu.dot_dimension_numbers<[1], [0], [0], [1], [0, 0, 1, 1], [], []>} : vector<16x32xf32>, vector<32x128xf32>, vector<16x128xf32> -> vector<16x128xf32>
    %c0_85 = arith.constant 0 : index
    %c0_86 = arith.constant 0 : index
    %250 = vector.load %arg8[%c0_85, %c0_86] : memref<16x128xf32, #tpu.memory_space<vmem>>, vector<16x128xf32>
    tpu.vector_store %arg8[%c0_85, %c0_86], %249 {strides = array<i32>} : memref<16x128xf32, #tpu.memory_space<vmem>>, vector<16x128xf32>,
    return
  }
}

</mosaic_0001>

<bundles_post_ra>
// kernel: tpu_custom_call.1
= control target key start
LH: loop header
LB: loop body
LE: loop exit
PB: predicated region body
PF: predicated region fallthrough
CT: control target
= control target key end

     0   :  { %vm35_vm0 = vcmask 261120   ;;  %s3588_s0 = inlined_call_operand.vmem [shape: f32[16,32], index: 0, kind: input, shape index: {}]   ;;  %s3589_s1 = inlined_call_operand.vmem [shape: f32[2,8,8], index: 1, kind: input, shape index: {}]   ;;  %s3590_s2 = inlined_call_operand.vmem [shape: f32[32,128], index: 2, kind: input, shape index: {}]   ;;  %s3591_s3 = inlined_call_operand.vmem [shape: f32[2,32,96], index: 3, kind: input, shape index: {}]   ;;  %s3592_s4 = inlined_call_operand.vmem [shape: f32[2,32,32], index: 4, kind: input, shape index: {}]   ;;  %s3593_s5 = inlined_call_operand.vmem [shape: f32[2,32,128], index: 5, kind: input, shape index: {}]   ;;  %s3594_s6 = inlined_call_operand.vmem [shape: f32[2,128,32], index: 6, kind: input, shape index: {}]   ;;  %s3595_s7 = inlined_call_operand.vmem [shape: f32[2,8,128], index: 7, kind: input, shape index: {}]   ;;  %s3596_s8 = inlined_call_operand.hbm [shape: f32[16,128], index: 8, kind: output, shape index: {}]  }
   0x1   :  { %v3070_v0 = vld [vmem:[%s3588_s0] sm:$0xff]  ;;  %v3075_v1 = vld [vmem:[%s3588_s0 + $0x8] sm:$0xff] }
   0x2   :  { %13 = vsyncpa [#allocation3], 0  ;;  %v36_v2 = vsel %vm35_vm0, %v3070_v0, 0.0  ;;  %v45_v3 = vmul.f32 %v3070_v0, %v3070_v0  ;;  %v46_v4 = vmul.f32 %v3075_v1, %v3075_v1  ;;  %v39_v6 = vsel %vm35_vm0, %v3075_v1, 0.0  ;;  %v81_v8 = vld [vmem:[%s3591_s3] sm:$0xff]  ;;  %v82_v9 = vld [vmem:[%s3591_s3 + $0x8] sm:$0xff] }
   0x3   :  { %37 = vadd.xlane.f32.xlu0 %v36_v2  ;;  %v83_v10 = vld [vmem:[%s3591_s3 + $0x10] sm:$0xff]  ;;  %v2808_v11 = vpack.c.bf16 %v82_v9, %v81_v8  ;;  %v84_v12 = vld [vmem:[%s3591_s3 + $0x18] sm:$0xff]  ;;  %v69_v26 = vlaneseq  ;;  %v3105_v33 = vld [vmem:[%s3595_s7] sm:$0xff]  ;;  %v3011_v47 = vmov 0.0   ;;  %vm3012_vm1 = vmmov 0   ;;  %s3013_s18 = smov 96  }
   0x4   :  { %v47_v5 = vsel %vm35_vm0, %v45_v3, 0.0  ;;  %v50_v7 = vsel %vm35_vm0, %v46_v4, 0.0  ;;  %v2812_v13 = vpack.c.bf16 %v84_v12, %v83_v10  ;;  %2612 = vmatprep.subr.mxu0 %v3011_v47  ;;  %2614 = vmatprep.mubr.msk.f32.mxu0 %vm3012_vm1, %v3011_v47  ;;  %vm173_vm2 = vcmask 130048   ;;  %v3151_v56 = vld [vmem:[%s3589_s1] sm:$0xff]  ;;  %v3157_v60 = vld [vmem:[%s3589_s1 + $0x8] sm:$0xff]  ;;  %s3014_s23 = smov 64  }
   0x5   :  { %48 = vadd.xlane.f32.xlu1 %v47_v5  ;;  %2809 = vmatprep.subr.bf16.mxu1 %v2808_v11  ;;  %v3099_v30 = vshrl.u32 %v69_v26, 7  ;;  %vm325_vm3 = vcmask 64512   ;;  %s3015_s24 = smov 80   ;;  %s3016_s1 = smov 112  }
   0x6   :  { %2811 = vmatpush3.bf16.msra.mxu1 %v2808_v11  ;;  %s3017_s25 = smov 48   ;;  %s3018_s11 = smov 16  }
   0x7   :  { %40 = vadd.xlane.f32.xlu0 %v39_v6  ;;  %2813 = vmatprep.subr.bf16.mxu1 %v2812_v13  ;;  %v71_v32 = vsub.s32 0, %v3099_v30  ;;  %v77_v34 = vsub.s32 1, %v3099_v30  ;;  %v87_v48 = vsub.s32 2, %v3099_v30 }
   0x9   :  { %51 = vadd.xlane.f32.xlu1 %v50_v7  ;;  %v72_v36 = vrot.slane %v3105_v33, %v71_v32  ;;  %v78_v39 = vrot.slane %v3105_v33, %v77_v34  ;;  %v88_v49 = vrot.slane %v3105_v33, %v87_v48 }
   0xa   :  { %2815 = vmatpush3.bf16.msra.mxu1 %v2812_v13 }
   0xb   :  { %2592 = vmatprep.subr.mxu1 %v3011_v47 }
  0x90   :  { %v38_v14 = vpop.xlane.xlu0 %37 }
  0x91   :  { %v43_v15 = vmul.f32 0.03125, %v38_v14 }
  0x92   :  { %v49_v16 = vpop.xlane.xlu1 %48 }
  0x93   :  { %v55_v17 = vmul.f32 %v43_v15, %v43_v15  ;;  %v53_v18 = vmul.f32 0.03125, %v49_v16  ;;  %v61_v35 = vsub.f32 %v3070_v0, %v43_v15 }
  0x94   :  { %v41_v19 = vpop.xlane.xlu0 %40 }
  0x95   :  { %v57_v20 = vsub.f32 %v53_v18, %v55_v17  ;;  %v44_v21 = vmul.f32 0.03125, %v41_v19 }
  0x96   :  { %v52_v22 = vpop.xlane.xlu1 %51 }
  0x97   :  { %v59_v23 = vmax.f32 %v57_v20, 0.0  ;;  %v56_v24 = vmul.f32 %v44_v21, %v44_v21  ;;  %v54_v25 = vmul.f32 0.03125, %v52_v22  ;;  %v62_v40 = vsub.f32 %v3075_v1, %v44_v21 }
  0x99   :  { %v63_v27 = vadd.f32 1e-05, %v59_v23  ;;  %v58_v28 = vsub.f32 %v54_v25, %v56_v24 }
  0x9b   :  { %2939 = vrsqrt.f32 %v63_v27  ;;  %v60_v29 = vmax.f32 %v58_v28, 0.0 }
  0x9d   :  { %v64_v31 = vadd.f32 1e-05, %v60_v29 }
  0x9f   :  { %2941 = vrsqrt.f32 %v64_v31 }
  0xa5   :  { %v2940_v37 = vpop.eup %2939 }
  0xa6   :  { %v67_v38 = vmul.f32 %v2940_v37, %v61_v35 }
  0xa8   :  { %v73_v41 = vmul.f32 %v72_v36, %v67_v38 }
  0xa9   :  { %v2942_v42 = vpop.eup %2941 }
  0xaa   :  { %v68_v43 = vmul.f32 %v2942_v42, %v62_v40  ;;  %v79_v44 = vadd.f32 %v78_v39, %v73_v41 }
  0xac   :  { %v74_v45 = vmul.f32 %v72_v36, %v68_v43  ;;  %2589 = vmatprep.mubr.msk.f32.mxu1 %vm35_vm0, %v79_v44 }
  0xae   :  { %v80_v46 = vadd.f32 %v78_v39, %v74_v45 }
  0xb0   :  { %2590 = vmatmul.mubr.msk.f32.vlgmr.msra.gmra.mrb[0].mxu1 %vm35_vm0, %v80_v46 }
  0xb1   :  { %2594 = vmatprep.mubr.msk.f32.mxu1 %vm3012_vm1, %v3011_v47 }
 0x183   :  { %v2591_v50 = vpop.f32.mrb[0].mxu1 }
 0x184   :  { %v3128_v51 = vadd.f32 %v2591_v50, %v88_v49  ;;  %v161_v52 = vpop.f32.mrb[1].mxu1 }
 0x185   :  { %v3130_v53 = vadd.f32 %v161_v52, %v88_v49 }
 0x186   :  { %249 = vrot.lane.b32.xlu1 %v3128_v51, %s3013_s18 }
 0x187   :  { %171 = vrot.lane.b32.xlu0 %v3130_v53, %s3013_s18 }
 0x1f8   :  { %v250_v55 = vpop.permute.xlu1 %249 }
 0x1f9   :  { %v172_v54 = vpop.permute.xlu0 %171 }
 0x1fa   :  { %2593 = vmatpush3.xpose.msk.msra.mxu1 %vm173_vm2, %v172_v54 }
 0x1fb   :  { %2597 = vmatprep.subr.mxu1 %v3011_v47 }
 0x1fd   :  { %2595 = vmatmul.mubr.msk.f32.vlgmr.msra.gmra.mrb[2].mxu1 %vm173_vm2, %v3130_v53 }
 0x1fe   :  { %2598 = vmatpush3.xpose.msk.msra.mxu1 %vm173_vm2, %v250_v55  ;;  %2599 = vmatprep.mubr.msk.f32.mxu1 %vm3012_vm1, %v3011_v47 }
 0x1ff   :  { %2602 = vmatprep.subr.mxu1 %v3011_v47 }
 0x201   :  { %2600 = vmatmul.mubr.msk.f32.vlgmr.msra.gmra.mrb[4].mxu1 %vm173_vm2, %v3128_v51 }
 0x202   :  { %2604 = vmatprep.mubr.msk.f32.mxu1 %vm3012_vm1, %v3011_v47 }
 0x2d0   :  { %v244_v57 = vpop.f32.mrb[2].mxu1 }
 0x2d1   :  { %v245_v58 = vadd.f32 %v244_v57, %v3151_v56  ;;  %v2596_v59 = vpop.f32.mrb[3].mxu1 }
 0x2d3   :  { %v326_v61 = vsel %vm325_vm3, %v245_v58, -inf }
 0x2d4   :  { %327 = vmax.xlane.f32.xlu1 %v326_v61  ;;  %v321_v62 = vpop.f32.mrb[4].mxu1 }
 0x2d5   :  { %v322_v63 = vadd.f32 %v321_v62, %v3157_v60  ;;  %v2601_v2 = vpop.f32.mrb[5].mxu1 }
 0x2d7   :  { %v329_v3 = vsel %vm325_vm3, %v322_v63, -inf }
 0x2d8   :  { %330 = vmax.xlane.f32.xlu0 %v329_v3  ;;  %v840_v3 = vld [vmem:[%s3592_s4] sm:$0xff] }
 0x2e5   :  { %424 = vrot.lane.b32.xlu1 %v3128_v51, %s3014_s23 }
 0x2e9   :  { %502 = vrot.lane.b32.xlu1 %v3130_v53, %s3015_s24 }
 0x2ed   :  { %580 = vrot.lane.b32.xlu1 %v3128_v51, %s3015_s24 }
 0x361   :  { %v328_v4 = vpop.xlane.xlu1 %327 }
 0x362   :  { %v332_v5 = vsub.f32 %v245_v58, %v328_v4 }
 0x364   :  { %v334_v6 = vmul.f32 1.442695, %v332_v5  ;;  %v842_v5 = vld [vmem:[%s3592_s4 + $0x10] sm:$0xff] }
 0x365   :  { %v425_v7 = vpop.permute.xlu1 %424  ;;  %v331_v8 = vpop.xlane.xlu0 %330 }
 0x366   :  { %2943 = vpow2.f32 %v334_v6  ;;  %v333_v9 = vsub.f32 %v322_v63, %v331_v8  ;;  %v843_v6 = vld [vmem:[%s3592_s4 + $0x18] sm:$0xff] }
 0x368   :  { %v336_v10 = vmul.f32 1.442695, %v333_v9 }
 0x369   :  { %v503_v11 = vpop.permute.xlu1 %502 }
 0x36a   :  { %2945 = vpow2.f32 %v336_v10  ;;  %2613 = vmatpush3.xpose.msk.msra.mxu0 %vm173_vm2, %v503_v11 }
 0x36b   :  { %2622 = vmatprep.subr.mxu0 %v3011_v47 }
 0x36d   :  { %v581_v16 = vpop.permute.xlu1 %580 }
 0x370   :  { %v2944_v12 = vpop.eup %2943 }
 0x371   :  { %v338_v13 = vsel %vm325_vm3, %v2944_v12, 0.0 }
 0x372   :  { %339 = vadd.xlane.f32.xlu0 %v338_v13 }
 0x374   :  { %v2946_v14 = vpop.eup %2945 }
 0x375   :  { %v341_v15 = vsel %vm325_vm3, %v2946_v14, 0.0 }
 0x376   :  { %342 = vadd.xlane.f32.xlu1 %v341_v15 }
 0x387   :  { %578 = vrot.lane.b32.xlu1 %v3128_v51, %s3016_s1 }
 0x388   :  { %348 = vrot.lane.b32.xlu0 %v3130_v53, %s3014_s23 }
 0x38c   :  { %500 = vrot.lane.b32.xlu0 %v3130_v53, %s3016_s1 }
 0x3ff   :  { %v340_v17 = vpop.xlane.xlu0 %339 }
 0x400   :  { %2947 = vrcp.f32 %v340_v17 }
 0x403   :  { %v343_v18 = vpop.xlane.xlu1 %342  ;;  %v349_v19 = vpop.permute.xlu0 %348 }
 0x404   :  { %2949 = vrcp.f32 %v343_v18  ;;  %2603 = vmatpush3.msra.mxu1 %v349_v19 }
 0x405   :  { %2607 = vmatprep.subr.mxu1 %v3011_v47 }
 0x407   :  { %v501_v20 = vpop.permute.xlu0 %500  ;;  %v579_v25 = vpop.permute.xlu1 %578 }
 0x408   :  { %2615 = vmatmul.mubr.msk.f32.vlgmr.msra.gmra.mrb[0].mxu0 %vm173_vm2, %v501_v20 }
 0x409   :  { %2624 = vmatprep.mubr.msk.f32.mxu0 %vm3012_vm1, %v3011_v47 }
 0x40a   :  { %v2948_v21 = vpop.eup %2947 }
 0x40b   :  { %v346_v22 = vmul.f32 %v2948_v21, %v2944_v12 }
 0x40d   :  { %2605 = vmatmul.mubr.msk.f32.vlgmr.msra.gmra.mrb[6].mxu1 %vm325_vm3, %v346_v22 }
 0x40e   :  { %v2950_v23 = vpop.eup %2949  ;;  %2608 = vmatpush3.msra.mxu1 %v425_v7  ;;  %2609 = vmatprep.mubr.msk.f32.mxu1 %vm3012_vm1, %v3011_v47  ;;  %v2820_v7 = vpack.c.bf16 %v843_v6, %v842_v5 }
 0x40f   :  { %v347_v24 = vmul.f32 %v2950_v23, %v2946_v14  ;;  %2617 = vmatprep.subr.mxu1 %v3011_v47 }
 0x411   :  { %2610 = vmatmul.mubr.msk.f32.vlgmr.msra.gmra.mrb[8].mxu1 %vm325_vm3, %v347_v24 }
 0x412   :  { %2619 = vmatprep.mubr.msk.f32.mxu1 %vm3012_vm1, %v3011_v47 }
 0x415   :  { %2618 = vmatpush3.xpose.msk.msra.mxu1 %vm173_vm2, %v581_v16  ;;  %v929_v16 = vsub.s32 3, %v3099_v30 }
 0x416   :  { %2627 = vmatprep.subr.mxu1 %v3011_v47 }
 0x417   :  { %v930_v17 = vrot.slane %v3105_v33, %v929_v16 }
 0x418   :  { %2620 = vmatmul.mubr.msk.f32.vlgmr.msra.gmra.mrb[10].mxu1 %vm173_vm2, %v579_v25 }
 0x419   :  { %2629 = vmatprep.mubr.msk.f32.mxu1 %vm3012_vm1, %v3011_v47 }
 0x4db   :  { %v574_v26 = vpop.f32.mrb[0].mxu0 }
 0x4dc   :  { %v575_v27 = vadd.f32 %v574_v26, %v3151_v56  ;;  %v2616_v28 = vpop.f32.mrb[1].mxu0 }
 0x4dd   :  { %v977_v28 = vld [vmem:[%s3593_s5] sm:$0xff] }
 0x4de   :  { %v656_v29 = vsel %vm325_vm3, %v575_v27, -inf }
 0x4df   :  { %657 = vmax.xlane.f32.xlu0 %v656_v29  ;;  %v978_v29 = vld [vmem:[%s3593_s5 + $0x8] sm:$0xff] }
 0x4e0   :  { %v420_v31 = vpop.f32.mrb[6].mxu1 }
 0x4e1   :  { %v2606_v35 = vpop.f32.mrb[7].mxu1 }
 0x4e2   :  { %v979_v35 = vld [vmem:[%s3593_s5 + $0x10] sm:$0xff] }
 0x4e4   :  { %v496_v36 = vpop.f32.mrb[8].mxu1 }
 0x4e5   :  { %v2611_v37 = vpop.f32.mrb[9].mxu1 }
 0x4eb   :  { %v652_v38 = vpop.f32.mrb[10].mxu1 }
 0x4ec   :  { %v653_v39 = vadd.f32 %v652_v38, %v3157_v60  ;;  %v2621_v40 = vpop.f32.mrb[11].mxu1  ;;  %v1068_v38 = vld [vmem:[%s3594_s6] sm:$0xff] }
 0x4ed   :  { %v1070_v40 = vld [vmem:[%s3594_s6 + $0x10] sm:$0xff] }
 0x4ee   :  { %v659_v41 = vsel %vm325_vm3, %v653_v39, -inf }
 0x4ef   :  { %660 = vmax.xlane.f32.xlu1 %v659_v41 }
 0x500   :  { %754 = vrot.lane.b32.xlu1 %v3128_v51, %s3017_s25 }
 0x56c   :  { %v658_v42 = vpop.xlane.xlu0 %657 }
 0x56d   :  { %v662_v43 = vsub.f32 %v575_v27, %v658_v42  ;;  %v1071_v42 = vld [vmem:[%s3594_s6 + $0x18] sm:$0xff] }
 0x56f   :  { %v664_v44 = vmul.f32 1.442695, %v662_v43  ;;  %v2836_v43 = vpack.c.bf16 %v1071_v42, %v1070_v40 }
 0x571   :  { %2951 = vpow2.f32 %v664_v44  ;;  %v1072_v44 = vld [vmem:[%s3594_s6 + $0x20] sm:$0xff] }
 0x57b   :  { %v2952_v45 = vpop.eup %2951 }
 0x57c   :  { %v661_v46 = vpop.xlane.xlu1 %660  ;;  %v668_v49 = vsel %vm325_vm3, %v2952_v45, 0.0 }
 0x57d   :  { %v663_v50 = vsub.f32 %v653_v39, %v661_v46  ;;  %669 = vadd.xlane.f32.xlu0 %v668_v49  ;;  %v1069_v39 = vld [vmem:[%s3594_s6 + $0x8] sm:$0xff]  ;;  %v1074_v49 = vld [vmem:[%s3594_s6 + $0x30] sm:$0xff] }
 0x57e   :  { %v2832_v41 = vpack.c.bf16 %v1069_v39, %v1068_v38  ;;  %v983_v39 = vsub.s32 6, %v3099_v30 }
 0x57f   :  { %v666_v52 = vmul.f32 1.442695, %v663_v50  ;;  %v1075_v50 = vld [vmem:[%s3594_s6 + $0x38] sm:$0xff] }
 0x580   :  { %v755_v54 = vpop.permute.xlu1 %754  ;;  %v984_v40 = vrot.slane %v3105_v33, %v983_v39 }
 0x581   :  { %2953 = vpow2.f32 %v666_v52  ;;  %2628 = vmatpush3.msra.mxu1 %v755_v54  ;;  %v2844_v52 = vpack.c.bf16 %v1075_v50, %v1074_v49  ;;  %v1076_v54 = vld [vmem:[%s3594_s6 + $0x40] sm:$0xff]  ;;  %v1163_v49 = vsub.s32 7, %v3099_v30 }
 0x583   :  { %v1164_v50 = vrot.slane %v3105_v33, %v1163_v49 }
 0x58b   :  { %v2954_v55 = vpop.eup %2953 }
 0x58c   :  { %v671_v57 = vsel %vm325_vm3, %v2954_v55, 0.0 }
 0x58d   :  { %672 = vadd.xlane.f32.xlu0 %v671_v57 }
 0x5a3   :  { %678 = vrot.lane.b32.xlu0 %v3130_v53, %s3017_s25  ;;  %v841_v53 = vld [vmem:[%s3592_s4 + $0x8] sm:$0xff] }
 0x5a4   :  { %v2816_v4 = vpack.c.bf16 %v841_v53, %v840_v3 }
 0x60a   :  { %v670_v51 = vpop.xlane.xlu0 %669 }
 0x60b   :  { %2955 = vrcp.f32 %v670_v51  ;;  %v1078_v51 = vld [vmem:[%s3594_s6 + $0x50] sm:$0xff] }
 0x615   :  { %v2956_v59 = vpop.eup %2955 }
 0x616   :  { %v676_v61 = vmul.f32 %v2956_v59, %v2952_v45  ;;  %v1073_v45 = vld [vmem:[%s3594_s6 + $0x28] sm:$0xff] }
 0x617   :  { %v2840_v46 = vpack.c.bf16 %v1073_v45, %v1072_v44 }
 0x61a   :  { %v673_v58 = vpop.xlane.xlu0 %672 }
 0x61b   :  { %2957 = vrcp.f32 %v673_v58  ;;  %v1079_v58 = vld [vmem:[%s3594_s6 + $0x58] sm:$0xff] }
 0x61c   :  { %v2852_v59 = vpack.c.bf16 %v1079_v58, %v1078_v51 }
 0x61e   :  { %v679_v62 = vpop.permute.xlu0 %678 }
 0x61f   :  { %2623 = vmatpush3.msra.mxu0 %v679_v62  ;;  %v1081_v62 = vld [vmem:[%s3594_s6 + $0x68] sm:$0xff] }
 0x620   :  { %2625 = vmatmul.mubr.msk.f32.vlgmr.msra.gmra.mrb[2].mxu0 %vm325_vm3, %v676_v61  ;;  %2817 = vmatprep.subr.bf16.mxu0 %v2816_v4  ;;  %v1080_v61 = vld [vmem:[%s3594_s6 + $0x60] sm:$0xff] }
 0x621   :  { %2819 = vmatpush3.bf16.msra.mxu0 %v2816_v4 }
 0x622   :  { %2821 = vmatprep.subr.bf16.mxu0 %v2820_v7 }
 0x625   :  { %v2958_v63 = vpop.eup %2957  ;;  %2823 = vmatpush3.bf16.msra.mxu0 %v2820_v7 }
 0x626   :  { %v677_v2 = vmul.f32 %v2958_v63, %v2954_v55  ;;  %2833 = vmatprep.subr.bf16.mxu0 %v2832_v41  ;;  %v1077_v55 = vld [vmem:[%s3594_s6 + $0x48] sm:$0xff]  ;;  %v2856_v63 = vpack.c.bf16 %v1081_v62, %v1080_v61 }
 0x627   :  { %v2848_v57 = vpack.c.bf16 %v1077_v55, %v1076_v54 }
 0x628   :  { %2630 = vmatmul.mubr.msk.f32.vlgmr.msra.gmra.mrb[12].mxu1 %vm325_vm3, %v677_v2 }
 0x6f3   :  { %v750_v8 = vpop.f32.mrb[2].mxu0 }
 0x6f4   :  { %832 = vrot.lane.b32.xlu1 %v750_v8, %s3018_s11  ;;  %v2626_v9 = vpop.f32.mrb[3].mxu0 }
 0x6fb   :  { %v826_v10 = vpop.f32.mrb[12].mxu1 }
 0x6fc   :  { %834 = vrot.lane.b32.xlu1 %v826_v10, %s3018_s11  ;;  %v2631_v11 = vpop.f32.mrb[13].mxu1 }
 0x766   :  { %v833_v12 = vpop.permute.xlu1 %832 }
 0x767   :  { %v838_v13 = vsel %vm173_vm2, %v420_v31, %v833_v12  ;;  %v2824_v31 = vpack.c.bf16 %v978_v29, %v977_v28 }
 0x768   :  { %2640 = vmatprep.mubr.msk.f32.mxu0 %vm35_vm0, %v838_v13 }
 0x769   :  { %2825 = vmatprep.subr.bf16.mxu1 %v2824_v31 }
 0x76a   :  { %2827 = vmatpush3.bf16.msra.mxu1 %v2824_v31 }
 0x76e   :  { %v835_v14 = vpop.permute.xlu1 %834 }
 0x76f   :  { %v839_v15 = vsel %vm173_vm2, %v496_v36, %v835_v14  ;;  %v980_v36 = vld [vmem:[%s3593_s5 + $0x18] sm:$0xff] }
 0x770   :  { %2641 = vmatmul.mubr.msk.f32.vlgmr.msra.gmra.mrb[4].mxu0 %vm35_vm0, %v839_v15  ;;  %v2828_v37 = vpack.c.bf16 %v980_v36, %v979_v35  ;;  %v1082_v36 = vld [vmem:[%s3594_s6 + $0x70] sm:$0xff] }
 0x771   :  { %2835 = vmatpush3.bf16.msra.mxu0 %v2832_v41 }
 0x772   :  { %2829 = vmatprep.subr.bf16.mxu1 %v2828_v37  ;;  %2837 = vmatprep.subr.bf16.mxu0 %v2836_v43 }
 0x773   :  { %2831 = vmatpush3.bf16.msra.mxu1 %v2828_v37  ;;  %v1083_v37 = vld [vmem:[%s3594_s6 + $0x78] sm:$0xff] }
 0x774   :  { %v2860_v38 = vpack.c.bf16 %v1083_v37, %v1082_v36 }
 0x775   :  { %2839 = vmatpush3.bf16.msra.mxu0 %v2836_v43 }
 0x776   :  { %2841 = vmatprep.subr.bf16.mxu0 %v2840_v46 }
 0x779   :  { %2843 = vmatpush3.bf16.msra.mxu0 %v2840_v46 }
 0x77a   :  { %2845 = vmatprep.subr.bf16.mxu0 %v2844_v52 }
 0x77d   :  { %2847 = vmatpush3.bf16.msra.mxu0 %v2844_v52 }
 0x77e   :  { %2849 = vmatprep.subr.bf16.mxu0 %v2848_v57 }
 0x781   :  { %2851 = vmatpush3.bf16.msra.mxu0 %v2848_v57 }
 0x782   :  { %2853 = vmatprep.subr.bf16.mxu0 %v2852_v59 }
 0x785   :  { %2855 = vmatpush3.bf16.msra.mxu0 %v2852_v59 }
 0x786   :  { %2857 = vmatprep.subr.bf16.mxu0 %v2856_v63 }
 0x789   :  { %2859 = vmatpush3.bf16.msra.mxu0 %v2856_v63  ;;  %v2423_v63 = vld [vmem:[%s3591_s3 + $0x20] sm:$0xff] }
 0x78a   :  { %2861 = vmatprep.subr.bf16.mxu0 %v2860_v38 }
 0x78d   :  { %2863 = vmatpush3.bf16.msra.mxu0 %v2860_v38 }
 0x78e   :  { %2730 = vmatprep.subr.mxu0 %v3011_v47 }
 0x843   :  { %v2642_v18 = vpop.f32.mrb[4].mxu0 }
 0x844   :  { %v926_v19 = vadd.f32 %v2642_v18, %v3075_v1  ;;  %v916_v20 = vpop.f32.mrb[5].mxu0  ;;  %v967_v18 = vsub.s32 4, %v3099_v30 }
 0x845   :  { %v925_v21 = vadd.f32 %v916_v20, %v3070_v0 }
 0x846   :  { %v3230_v22 = vadd.f32 %v930_v17, %v926_v19  ;;  %v973_v19 = vsub.s32 5, %v3099_v30 }
 0x847   :  { %v3232_v23 = vadd.f32 %v930_v17, %v925_v21  ;;  %v968_v21 = vrot.slane %v3105_v33, %v967_v18 }
 0x848   :  { %v936_v24 = vsel %vm35_vm0, %v3230_v22, 0.0  ;;  %v942_v0 = vmul.f32 %v3230_v22, %v3230_v22 }
 0x849   :  { %937 = vadd.xlane.f32.xlu1 %v936_v24  ;;  %v933_v25 = vsel %vm35_vm0, %v3232_v23, 0.0  ;;  %v941_v26 = vmul.f32 %v3232_v23, %v3232_v23 }
 0x84a   :  { %934 = vadd.xlane.f32.xlu0 %v933_v25  ;;  %v946_v27 = vsel %vm35_vm0, %v942_v0, 0.0 }
 0x84b   :  { %v943_v1 = vsel %vm35_vm0, %v941_v26, 0.0  ;;  %v974_v26 = vrot.slane %v3105_v33, %v973_v19 }
 0x84e   :  { %944 = vadd.xlane.f32.xlu0 %v943_v1 }
 0x852   :  { %947 = vadd.xlane.f32.xlu0 %v946_v27 }
 0x8d6   :  { %v938_v53 = vpop.xlane.xlu1 %937 }
 0x8d7   :  { %v935_v2 = vpop.xlane.xlu0 %934  ;;  %v940_v5 = vmul.f32 0.03125, %v938_v53  ;;  %v2425_v53 = vld [vmem:[%s3591_s3 + $0x30] sm:$0xff] }
 0x8d8   :  { %v939_v3 = vmul.f32 0.03125, %v935_v2  ;;  %v2424_v2 = vld [vmem:[%s3591_s3 + $0x28] sm:$0xff] }
 0x8d9   :  { %v952_v10 = vmul.f32 %v940_v5, %v940_v5  ;;  %v958_v1 = vsub.f32 %v3230_v22, %v940_v5 }
 0x8da   :  { %v951_v6 = vmul.f32 %v939_v3, %v939_v3  ;;  %v957_v20 = vsub.f32 %v3232_v23, %v939_v3  ;;  %v2864_v3 = vpack.c.bf16 %v2424_v2, %v2423_v63 }
 0x8db   :  { %v945_v4 = vpop.xlane.xlu0 %944 }
 0x8dc   :  { %v949_v7 = vmul.f32 0.03125, %v945_v4  ;;  %2865 = vmatprep.subr.bf16.mxu1 %v2864_v3  ;;  %v2426_v4 = vld [vmem:[%s3591_s3 + $0x38] sm:$0xff] }
 0x8dd   :  { %v2868_v5 = vpack.c.bf16 %v2426_v4, %v2425_v53 }
 0x8de   :  { %v953_v8 = vsub.f32 %v949_v7, %v951_v6 }
 0x8df   :  { %v948_v9 = vpop.xlane.xlu0 %947 }
 0x8e0   :  { %v955_v11 = vmax.f32 %v953_v8, 0.0  ;;  %v950_v12 = vmul.f32 0.03125, %v948_v9 }
 0x8e2   :  { %v959_v13 = vadd.f32 1e-05, %v955_v11  ;;  %v954_v14 = vsub.f32 %v950_v12, %v952_v10 }
 0x8e4   :  { %2959 = vrsqrt.f32 %v959_v13  ;;  %v956_v15 = vmax.f32 %v954_v14, 0.0 }
 0x8e6   :  { %v960_v17 = vadd.f32 1e-05, %v956_v15 }
 0x8e8   :  { %2961 = vrsqrt.f32 %v960_v17 }
 0x8ee   :  { %v2960_v24 = vpop.eup %2959 }
 0x8ef   :  { %v963_v25 = vmul.f32 %v2960_v24, %v957_v20 }
 0x8f1   :  { %v969_v0 = vmul.f32 %v968_v21, %v963_v25 }
 0x8f2   :  { %v2962_v27 = vpop.eup %2961 }
 0x8f3   :  { %v964_v28 = vmul.f32 %v2962_v27, %v958_v1  ;;  %v975_v29 = vadd.f32 %v974_v26, %v969_v0  ;;  %v3359_v1 = vld [vmem:[%s3595_s7 + $0x8] sm:$0xff] }
 0x8f4   :  { %v1204_v0 = vrot.slane %v3359_v1, %v71_v32  ;;  %v1221_v32 = vrot.slane %v3359_v1, %v87_v48 }
 0x8f5   :  { %v970_v31 = vmul.f32 %v968_v21, %v964_v28  ;;  %2651 = vmatprep.mubr.msk.f32.mxu1 %vm35_vm0, %v975_v29 }
 0x8f7   :  { %v976_v35 = vadd.f32 %v974_v26, %v970_v31 }
 0x8f9   :  { %2652 = vmatmul.mubr.msk.f32.vlgmr.msra.gmra.mrb[14].mxu1 %vm35_vm0, %v976_v35  ;;  %v1210_v35 = vrot.slane %v3359_v1, %v77_v34 }
 0x8fa   :  { %2867 = vmatpush3.bf16.msra.mxu1 %v2864_v3 }
 0x8fb   :  { %2869 = vmatprep.subr.bf16.mxu1 %v2868_v5 }
 0x8fe   :  { %2871 = vmatpush3.bf16.msra.mxu1 %v2868_v5 }
 0x8ff   :  { %2700 = vmatprep.subr.mxu1 %v3011_v47 }
 0x9cc   :  { %v2653_v41 = vpop.f32.mrb[14].mxu1 }
 0x9cd   :  { %v1063_v42 = vadd.f32 %v2653_v41, %v984_v40  ;;  %v1057_v43 = vpop.f32.mrb[15].mxu1 }
 0x9ce   :  { %v1058_v44 = vadd.f32 %v1057_v43, %v984_v40 }
 0x9cf   :  { %v1067_v46 = vmax.f32 %v1063_v42, 0.0 }
 0x9d0   :  { %v1066_v45 = vmax.f32 %v1058_v44, 0.0 }
 0x9d2   :  { %2686 = vmatprep.mubr.f32.mxu0 %v1066_v45 }
 0x9d3   :  { %2687 = vmatmul.mubr.f32.vlgmr.msra.gmra.mrb[6].mxu0 %v1067_v46 }
 0x9d4   :  { %2732 = vmatprep.mubr.msk.f32.mxu0 %vm3012_vm1, %v3011_v47 }
 0xaa6   :  { %v2688_v52 = vpop.f32.mrb[6].mxu0 }
 0xaa7   :  { %v1160_v54 = vadd.f32 %v2688_v52, %v3230_v22  ;;  %v1150_v55 = vpop.f32.mrb[7].mxu0 }
 0xaa8   :  { %v1159_v57 = vadd.f32 %v1150_v55, %v3232_v23 }
 0xaa9   :  { %v3329_v51 = vadd.f32 %v1164_v50, %v1160_v54 }
 0xaaa   :  { %v3331_v58 = vadd.f32 %v1164_v50, %v1159_v57 }
 0xaab   :  { %v1172_v59 = vsel %vm35_vm0, %v3329_v51, 0.0  ;;  %v1178_v61 = vmul.f32 %v3329_v51, %v3329_v51 }
 0xaac   :  { %1173 = vadd.xlane.f32.xlu1 %v1172_v59  ;;  %v1169_v33 = vsel %vm35_vm0, %v3331_v58, 0.0  ;;  %v1177_v22 = vmul.f32 %v3331_v58, %v3331_v58 }
 0xaad   :  { %1170 = vadd.xlane.f32.xlu0 %v1169_v33  ;;  %v1182_v23 = vsel %vm35_vm0, %v1178_v61, 0.0 }
 0xaae   :  { %v1179_v62 = vsel %vm35_vm0, %v1177_v22, 0.0 }
 0xab0   :  { %1183 = vadd.xlane.f32.xlu1 %v1182_v23 }
 0xab1   :  { %1180 = vadd.xlane.f32.xlu0 %v1179_v62 }
 0xb39   :  { %v1174_v6 = vpop.xlane.xlu1 %1173 }
 0xb3a   :  { %v1176_v7 = vmul.f32 0.03125, %v1174_v6  ;;  %v1171_v8 = vpop.xlane.xlu0 %1170 }
 0xb3b   :  { %v1175_v9 = vmul.f32 0.03125, %v1171_v8 }
 0xb3c   :  { %v1188_v11 = vmul.f32 %v1176_v7, %v1176_v7  ;;  %v1194_v27 = vsub.f32 %v3329_v51, %v1176_v7 }
 0xb3d   :  { %v1184_v10 = vpop.xlane.xlu1 %1183  ;;  %v1187_v14 = vmul.f32 %v1175_v9, %v1175_v9  ;;  %v1193_v29 = vsub.f32 %v3331_v58, %v1175_v9 }
 0xb3e   :  { %v1186_v12 = vmul.f32 0.03125, %v1184_v10  ;;  %v1181_v13 = vpop.xlane.xlu0 %1180 }
 0xb3f   :  { %v1185_v15 = vmul.f32 0.03125, %v1181_v13 }
 0xb40   :  { %v1190_v17 = vsub.f32 %v1186_v12, %v1188_v11 }
 0xb41   :  { %v1189_v20 = vsub.f32 %v1185_v15, %v1187_v14 }
 0xb42   :  { %v1192_v21 = vmax.f32 %v1190_v17, 0.0 }
 0xb43   :  { %v1191_v24 = vmax.f32 %v1189_v20, 0.0 }
 0xb44   :  { %v1196_v25 = vadd.f32 1e-05, %v1192_v21 }
 0xb45   :  { %v1195_v26 = vadd.f32 1e-05, %v1191_v24 }
 0xb46   :  { %2963 = vrsqrt.f32 %v1196_v25 }
 0xb47   :  { %2965 = vrsqrt.f32 %v1195_v26 }
 0xb50   :  { %v2964_v28 = vpop.eup %2963 }
 0xb51   :  { %v2966_v31 = vpop.eup %2965  ;;  %v1200_v36 = vmul.f32 %v2964_v28, %v1194_v27 }
 0xb52   :  { %v1199_v37 = vmul.f32 %v2966_v31, %v1193_v29 }
 0xb53   :  { %v1206_v38 = vmul.f32 %v1204_v0, %v1200_v36 }
 0xb54   :  { %v1205_v40 = vmul.f32 %v1204_v0, %v1199_v37 }
 0xb55   :  { %v1212_v41 = vadd.f32 %v1210_v35, %v1206_v38 }
 0xb56   :  { %v1211_v42 = vadd.f32 %v1210_v35, %v1205_v40 }
 0xb58   :  { %2697 = vmatprep.mubr.msk.f32.mxu1 %vm35_vm0, %v1211_v42 }
 0xb59   :  { %2698 = vmatmul.mubr.msk.f32.vlgmr.msra.gmra.mrb[16].mxu1 %vm35_vm0, %v1212_v41 }
 0xb5a   :  { %2702 = vmatprep.mubr.msk.f32.mxu1 %vm3012_vm1, %v3011_v47 }
 0xc2c   :  { %v2699_v43 = vpop.f32.mrb[16].mxu1 }
 0xc2d   :  { %v3376_v44 = vadd.f32 %v2699_v43, %v1221_v32  ;;  %v1294_v34 = vpop.f32.mrb[17].mxu1 }
 0xc2e   :  { %v3378_v45 = vadd.f32 %v1294_v34, %v1221_v32 }
 0xc2f   :  { %1381 = vrot.lane.b32.xlu1 %v3376_v44, %s3013_s18 }
 0xc30   :  { %1304 = vrot.lane.b32.xlu0 %v3378_v45, %s3013_s18 }
 0xca1   :  { %v1382_v50 = vpop.permute.xlu1 %1381 }
 0xca2   :  { %v1305_v46 = vpop.permute.xlu0 %1304 }
 0xca3   :  { %2701 = vmatpush3.xpose.msk.msra.mxu1 %vm173_vm2, %v1305_v46 }
 0xca4   :  { %2705 = vmatprep.subr.mxu1 %v3011_v47 }
 0xca6   :  { %2703 = vmatmul.mubr.msk.f32.vlgmr.msra.gmra.mrb[18].mxu1 %vm173_vm2, %v3378_v45 }
 0xca7   :  { %2706 = vmatpush3.xpose.msk.msra.mxu1 %vm173_vm2, %v1382_v50  ;;  %2707 = vmatprep.mubr.msk.f32.mxu1 %vm3012_vm1, %v3011_v47 }
 0xca8   :  { %2710 = vmatprep.subr.mxu1 %v3011_v47 }
 0xcaa   :  { %2708 = vmatmul.mubr.msk.f32.vlgmr.msra.gmra.mrb[20].mxu1 %vm173_vm2, %v3376_v44 }
 0xcab   :  { %2712 = vmatprep.mubr.msk.f32.mxu1 %vm3012_vm1, %v3011_v47 }
 0xd79   :  { %v1376_v48 = vpop.f32.mrb[18].mxu1 }
 0xd7a   :  { %v1377_v52 = vadd.f32 %v1376_v48, %v3151_v56  ;;  %v2704_v54 = vpop.f32.mrb[19].mxu1 }
 0xd7c   :  { %v1457_v55 = vsel %vm325_vm3, %v1377_v52, -inf }
 0xd7d   :  { %1458 = vmax.xlane.f32.xlu1 %v1457_v55  ;;  %v1453_v57 = vpop.f32.mrb[20].mxu1 }
 0xd7e   :  { %v1454_v59 = vadd.f32 %v1453_v57, %v3157_v60  ;;  %v2709_v61 = vpop.f32.mrb[21].mxu1 }
 0xd7f   :  { %v2441_v61 = vld [vmem:[%s3592_s4 + $0x20] sm:$0xff] }
 0xd80   :  { %v1460_v33 = vsel %vm325_vm3, %v1454_v59, -inf }
 0xd81   :  { %1461 = vmax.xlane.f32.xlu0 %v1460_v33 }
 0xd8e   :  { %1555 = vrot.lane.b32.xlu1 %v3376_v44, %s3014_s23 }
 0xd92   :  { %1633 = vrot.lane.b32.xlu1 %v3378_v45, %s3015_s24 }
 0xd96   :  { %1631 = vrot.lane.b32.xlu1 %v3378_v45, %s3016_s1 }
 0xe0a   :  { %v1459_v22 = vpop.xlane.xlu1 %1458 }
 0xe0b   :  { %v1463_v23 = vsub.f32 %v1377_v52, %v1459_v22  ;;  %v2443_v22 = vld [vmem:[%s3592_s4 + $0x30] sm:$0xff] }
 0xe0d   :  { %v1465_v62 = vmul.f32 1.442695, %v1463_v23  ;;  %v2444_v23 = vld [vmem:[%s3592_s4 + $0x38] sm:$0xff] }
 0xe0e   :  { %v1462_v63 = vpop.xlane.xlu0 %1461  ;;  %v1556_v7 = vpop.permute.xlu1 %1555 }
 0xe0f   :  { %2967 = vpow2.f32 %v1465_v62  ;;  %v1464_v2 = vsub.f32 %v1454_v59, %v1462_v63  ;;  %v2876_v62 = vpack.c.bf16 %v2444_v23, %v2443_v22 }
 0xe11   :  { %v1467_v3 = vmul.f32 1.442695, %v1464_v2 }
 0xe12   :  { %v1634_v8 = vpop.permute.xlu1 %1633 }
 0xe13   :  { %2969 = vpow2.f32 %v1467_v3 }
 0xe16   :  { %v1632_v9 = vpop.permute.xlu1 %1631 }
 0xe19   :  { %v2968_v53 = vpop.eup %2967 }
 0xe1a   :  { %v1469_v4 = vsel %vm325_vm3, %v2968_v53, 0.0 }
 0xe1b   :  { %1470 = vadd.xlane.f32.xlu0 %v1469_v4 }
 0xe1d   :  { %v2970_v5 = vpop.eup %2969 }
 0xe1e   :  { %v1472_v6 = vsel %vm325_vm3, %v2970_v5, 0.0 }
 0xe1f   :  { %1473 = vadd.xlane.f32.xlu1 %v1472_v6 }
 0xe30   :  { %1709 = vrot.lane.b32.xlu1 %v3376_v44, %s3016_s1 }
 0xe31   :  { %1479 = vrot.lane.b32.xlu0 %v3378_v45, %s3014_s23 }
 0xe35   :  { %1711 = vrot.lane.b32.xlu0 %v3376_v44, %s3015_s24 }
 0xea8   :  { %v1471_v10 = vpop.xlane.xlu0 %1470 }
 0xea9   :  { %2971 = vrcp.f32 %v1471_v10 }
 0xeac   :  { %v1474_v11 = vpop.xlane.xlu1 %1473  ;;  %v1480_v12 = vpop.permute.xlu0 %1479 }
 0xead   :  { %2973 = vrcp.f32 %v1474_v11  ;;  %2711 = vmatpush3.msra.mxu1 %v1480_v12 }
 0xeae   :  { %2715 = vmatprep.subr.mxu1 %v3011_v47 }
 0xeb0   :  { %v1712_v20 = vpop.permute.xlu0 %1711  ;;  %v1710_v21 = vpop.permute.xlu1 %1709 }
 0xeb3   :  { %v2972_v13 = vpop.eup %2971 }
 0xeb4   :  { %v1477_v14 = vmul.f32 %v2972_v13, %v2968_v53 }
 0xeb6   :  { %2713 = vmatmul.mubr.msk.f32.vlgmr.msra.gmra.mrb[22].mxu1 %vm325_vm3, %v1477_v14 }
 0xeb7   :  { %v2974_v15 = vpop.eup %2973  ;;  %2716 = vmatpush3.msra.mxu1 %v1556_v7  ;;  %2717 = vmatprep.mubr.msk.f32.mxu1 %vm3012_vm1, %v3011_v47 }
 0xeb8   :  { %v1478_v17 = vmul.f32 %v2974_v15, %v2970_v5  ;;  %2720 = vmatprep.subr.mxu1 %v3011_v47 }
 0xeba   :  { %2718 = vmatmul.mubr.msk.f32.vlgmr.msra.gmra.mrb[24].mxu1 %vm325_vm3, %v1478_v17 }
 0xebb   :  { %2722 = vmatprep.mubr.msk.f32.mxu1 %vm3012_vm1, %v3011_v47 }
 0xebe   :  { %2721 = vmatpush3.xpose.msk.msra.mxu1 %vm173_vm2, %v1634_v8  ;;  %v2062_v8 = vrot.slane %v3359_v1, %v929_v16 }
 0xebf   :  { %2725 = vmatprep.subr.mxu1 %v3011_v47 }
 0xec1   :  { %2723 = vmatmul.mubr.msk.f32.vlgmr.msra.gmra.mrb[26].mxu1 %vm173_vm2, %v1632_v9 }
 0xec2   :  { %2726 = vmatpush3.xpose.msk.msra.mxu1 %vm173_vm2, %v1712_v20  ;;  %2727 = vmatprep.mubr.msk.f32.mxu1 %vm3012_vm1, %v3011_v47 }
 0xec3   :  { %2735 = vmatprep.subr.mxu1 %v3011_v47 }
 0xec5   :  { %2728 = vmatmul.mubr.msk.f32.vlgmr.msra.gmra.mrb[28].mxu1 %vm173_vm2, %v1710_v21  ;;  %v2447_v21 = vld [vmem:[%s3593_s5 + $0x20] sm:$0xff] }
 0xec6   :  { %2737 = vmatprep.mubr.msk.f32.mxu1 %vm3012_vm1, %v3011_v47 }
 0xf89   :  { %v1551_v24 = vpop.f32.mrb[22].mxu1 }
 0xf8a   :  { %v2714_v25 = vpop.f32.mrb[23].mxu1 }
 0xf8d   :  { %v3432_v26 = vpop.f32.mrb[24].mxu1 }
 0xf8e   :  { %v2719_v0 = vpop.f32.mrb[25].mxu1 }
 0xf8f   :  { %v2450_v0 = vld [vmem:[%s3593_s5 + $0x38] sm:$0xff] }
 0xf94   :  { %v1705_v27 = vpop.f32.mrb[26].mxu1 }
 0xf95   :  { %v1706_v28 = vadd.f32 %v1705_v27, %v3151_v56  ;;  %v2724_v29 = vpop.f32.mrb[27].mxu1 }
 0xf96   :  { %v2454_v29 = vld [vmem:[%s3594_s6 + $0x88] sm:$0xff] }
 0xf97   :  { %v1787_v31 = vsel %vm325_vm3, %v1706_v28, -inf }
 0xf98   :  { %1788 = vmax.xlane.f32.xlu0 %v1787_v31  ;;  %v1783_v35 = vpop.f32.mrb[28].mxu1  ;;  %v2455_v31 = vld [vmem:[%s3594_s6 + $0x90] sm:$0xff] }
 0xf99   :  { %v1784_v36 = vadd.f32 %v1783_v35, %v3157_v60  ;;  %v2729_v37 = vpop.f32.mrb[29].mxu1 }
 0xf9b   :  { %v1790_v38 = vsel %vm325_vm3, %v1784_v36, -inf }
 0xf9c   :  { %1791 = vmax.xlane.f32.xlu1 %v1790_v38  ;;  %v2457_v38 = vld [vmem:[%s3594_s6 + $0xa0] sm:$0xff] }
 0xfad   :  { %1885 = vrot.lane.b32.xlu1 %v3376_v44, %s3017_s25 }
0x1025   :  { %v1789_v47 = vpop.xlane.xlu0 %1788 }
0x1026   :  { %v1793_v40 = vsub.f32 %v1706_v28, %v1789_v47  ;;  %v2453_v28 = vld [vmem:[%s3594_s6 + $0x80] sm:$0xff]  ;;  %v2458_v47 = vld [vmem:[%s3594_s6 + $0xa8] sm:$0xff] }
0x1027   :  { %v2888_v35 = vpack.c.bf16 %v2454_v29, %v2453_v28 }
0x1028   :  { %v1795_v41 = vmul.f32 1.442695, %v1793_v40  ;;  %v2896_v40 = vpack.c.bf16 %v2458_v47, %v2457_v38  ;;  %v2298_v47 = vrot.slane %v3359_v1, %v1163_v49 }
0x1029   :  { %v1792_v42 = vpop.xlane.xlu1 %1791 }
0x102a   :  { %2975 = vpow2.f32 %v1795_v41  ;;  %v1794_v56 = vsub.f32 %v1784_v36, %v1792_v42  ;;  %v2456_v36 = vld [vmem:[%s3594_s6 + $0x98] sm:$0xff]  ;;  %v2459_v41 = vld [vmem:[%s3594_s6 + $0xb0] sm:$0xff] }
0x102b   :  { %v2892_v37 = vpack.c.bf16 %v2456_v36, %v2455_v31  ;;  %v2460_v42 = vld [vmem:[%s3594_s6 + $0xb8] sm:$0xff]  ;;  %v2303_v36 = vld [vmem:[%s3590_s2 + $0x10] sm:$0xff] }
0x102c   :  { %v1797_v32 = vmul.f32 1.442695, %v1794_v56  ;;  %v2900_v56 = vpack.c.bf16 %v2460_v42, %v2459_v41 }
0x102d   :  { %v1886_v43 = vpop.permute.xlu1 %1885 }
0x102e   :  { %2977 = vpow2.f32 %v1797_v32  ;;  %2736 = vmatpush3.msra.mxu1 %v1886_v43  ;;  %v2461_v32 = vld [vmem:[%s3594_s6 + $0xc0] sm:$0xff]  ;;  %v2462_v43 = vld [vmem:[%s3594_s6 + $0xc8] sm:$0xff] }
0x1034   :  { %v2976_v34 = vpop.eup %2975 }
0x1035   :  { %v1799_v60 = vsel %vm325_vm3, %v2976_v34, 0.0 }
0x1036   :  { %1800 = vadd.xlane.f32.xlu0 %v1799_v60  ;;  %v2463_v60 = vld [vmem:[%s3594_s6 + $0xd0] sm:$0xff] }
0x1038   :  { %v2978_v46 = vpop.eup %2977 }
0x1039   :  { %v1802_v50 = vsel %vm325_vm3, %v2978_v46, 0.0 }
0x103a   :  { %1803 = vadd.xlane.f32.xlu0 %v1802_v50 }
0x1050   :  { %1809 = vrot.lane.b32.xlu0 %v3378_v45, %s3017_s25  ;;  %v2442_v45 = vld [vmem:[%s3592_s4 + $0x28] sm:$0xff] }
0x1051   :  { %v2872_v33 = vpack.c.bf16 %v2442_v45, %v2441_v61 }
0x10c3   :  { %v1801_v44 = vpop.xlane.xlu0 %1800 }
0x10c4   :  { %2979 = vrcp.f32 %v1801_v44  ;;  %v2465_v44 = vld [vmem:[%s3594_s6 + $0xe0] sm:$0xff] }
0x10c7   :  { %v1804_v48 = vpop.xlane.xlu0 %1803 }
0x10c8   :  { %2981 = vrcp.f32 %v1804_v48  ;;  %v2466_v48 = vld [vmem:[%s3594_s6 + $0xe8] sm:$0xff] }
0x10cb   :  { %v1810_v52 = vpop.permute.xlu0 %1809 }
0x10cc   :  { %2731 = vmatpush3.msra.mxu0 %v1810_v52  ;;  %v2912_v52 = vpack.c.bf16 %v2466_v48, %v2465_v44 }
0x10cd   :  { %2873 = vmatprep.subr.bf16.mxu0 %v2872_v33 }
0x10ce   :  { %v2980_v54 = vpop.eup %2979 }
0x10cf   :  { %v1807_v55 = vmul.f32 %v2980_v54, %v2976_v34  ;;  %v2904_v34 = vpack.c.bf16 %v2462_v43, %v2461_v32 }
0x10d1   :  { %2733 = vmatmul.mubr.msk.f32.vlgmr.msra.gmra.mrb[8].mxu0 %vm325_vm3, %v1807_v55 }
0x10d2   :  { %v2982_v57 = vpop.eup %2981  ;;  %2875 = vmatpush3.bf16.msra.mxu0 %v2872_v33 }
0x10d3   :  { %v1808_v59 = vmul.f32 %v2982_v57, %v2978_v46  ;;  %2877 = vmatprep.subr.bf16.mxu0 %v2876_v62  ;;  %v2464_v46 = vld [vmem:[%s3594_s6 + $0xd8] sm:$0xff] }
0x10d4   :  { %v2908_v50 = vpack.c.bf16 %v2464_v46, %v2463_v60 }
0x10d5   :  { %2738 = vmatmul.mubr.msk.f32.vlgmr.msra.gmra.mrb[30].mxu1 %vm325_vm3, %v1808_v59 }
0x10d6   :  { %2879 = vmatpush3.bf16.msra.mxu0 %v2876_v62 }
0x10d7   :  { %2889 = vmatprep.subr.bf16.mxu0 %v2888_v35 }
0x11a4   :  { %v1881_v63 = vpop.f32.mrb[8].mxu0 }
0x11a5   :  { %1963 = vrot.lane.b32.xlu1 %v1881_v63, %s3018_s11  ;;  %v2734_v2 = vpop.f32.mrb[9].mxu0 }
0x11a8   :  { %v1957_v3 = vpop.f32.mrb[30].mxu1 }
0x11a9   :  { %1965 = vrot.lane.b32.xlu1 %v1957_v3, %s3018_s11  ;;  %v2739_v53 = vpop.f32.mrb[31].mxu1 }
0x1217   :  { %v1964_v4 = vpop.permute.xlu1 %1963 }
0x1218   :  { %v1969_v5 = vsel %vm173_vm2, %v1551_v24, %v1964_v4  ;;  %v2448_v24 = vld [vmem:[%s3593_s5 + $0x28] sm:$0xff] }
0x1219   :  { %2748 = vmatprep.mubr.msk.f32.mxu0 %vm35_vm0, %v1969_v5  ;;  %v2880_v25 = vpack.c.bf16 %v2448_v24, %v2447_v21  ;;  %v2301_v21 = vld [vmem:[%s3590_s2] sm:$0xff]  ;;  %v2302_v24 = vld [vmem:[%s3590_s2 + $0x8] sm:$0xff] }
0x121b   :  { %v1966_v6 = vpop.permute.xlu1 %1965  ;;  %2881 = vmatprep.subr.bf16.mxu1 %v2880_v25 }
0x121c   :  { %v1970_v7 = vsel %vm173_vm2, %v3432_v26, %v1966_v6  ;;  %2883 = vmatpush3.bf16.msra.mxu1 %v2880_v25  ;;  %v2449_v26 = vld [vmem:[%s3593_s5 + $0x30] sm:$0xff]  ;;  %v2920_v25 = vpack.c.bf16 %v2302_v24, %v2301_v21 }
0x121d   :  { %2749 = vmatmul.mubr.msk.f32.vlgmr.msra.gmra.mrb[10].mxu0 %vm35_vm0, %v1970_v7  ;;  %v2884_v27 = vpack.c.bf16 %v2450_v0, %v2449_v26  ;;  %v2100_v7 = vrot.slane %v3359_v1, %v967_v18  ;;  %v2467_v18 = vld [vmem:[%s3594_s6 + $0xf0] sm:$0xff]  ;;  %v2117_v26 = vrot.slane %v3359_v1, %v983_v39 }
0x121e   :  { %2891 = vmatpush3.bf16.msra.mxu0 %v2888_v35 }
0x121f   :  { %2885 = vmatprep.subr.bf16.mxu1 %v2884_v27  ;;  %2893 = vmatprep.subr.bf16.mxu0 %v2892_v37 }
0x1220   :  { %2887 = vmatpush3.bf16.msra.mxu1 %v2884_v27 }
0x1221   :  { %2921 = vmatprep.subr.bf16.mxu1 %v2920_v25 }
0x1222   :  { %2895 = vmatpush3.bf16.msra.mxu0 %v2892_v37  ;;  %v2304_v37 = vld [vmem:[%s3590_s2 + $0x18] sm:$0xff]  ;;  %s3019_s2 = smov [#allocation2]  }
0x1223   :  { %2897 = vmatprep.subr.bf16.mxu0 %v2896_v40  ;;  %v2924_v38 = vpack.c.bf16 %v2304_v37, %v2303_v36  ;;  %s2393_s28 = sshll.u32 %s3019_s2, 4  ;;  %s2394_s28 = int_to_ptr.vmem [resolvable:$true] %s2393_s28 }
0x1224   :  { %s2987_s7 = scalar_lea.vmem %s2394_s28, 256  ;;  %p2992_p1 = scmp.lt.s32.totalorder %s2394_s28, %s2394_s28 }
0x1225   :  { %p2988_p0 = scmp.ne.s32.totalorder %s2394_s28, %s2987_s7  ;;  %p2993_p2 = scmp.lt.s32.totalorder %s2987_s7, %s2987_s7 }
0x1226   :  { %2899 = vmatpush3.bf16.msra.mxu0 %v2896_v40 }
0x1227   :  { %2901 = vmatprep.subr.bf16.mxu0 %v2900_v56  ;;  %p2994_p3 = por %p2993_p2, %p2992_p1 }
0x1229   :  { %p2995_p4 = pnand %p2994_p3, %p2988_p0 }
0x122a   :  { %2903 = vmatpush3.bf16.msra.mxu0 %v2900_v56 }
0x122b   :  { %2905 = vmatprep.subr.bf16.mxu0 %v2904_v34 }
0x122e   :  { %2907 = vmatpush3.bf16.msra.mxu0 %v2904_v34 }
0x122f   :  { %2909 = vmatprep.subr.bf16.mxu0 %v2908_v50 }
0x1232   :  { %2911 = vmatpush3.bf16.msra.mxu0 %v2908_v50 }
0x1233   :  { %2913 = vmatprep.subr.bf16.mxu0 %v2912_v52 }
0x1236   :  { %2915 = vmatpush3.bf16.msra.mxu0 %v2912_v52 }
0x12f0   :  { %v2750_v9 = vpop.f32.mrb[10].mxu0 }
0x12f1   :  { %v2058_v10 = vadd.f32 %v2750_v9, %v3329_v51  ;;  %v2048_v11 = vpop.f32.mrb[11].mxu0 }
0x12f2   :  { %v2057_v12 = vadd.f32 %v2048_v11, %v3331_v58 }
0x12f3   :  { %v3470_v13 = vadd.f32 %v2062_v8, %v2058_v10  ;;  %v2106_v10 = vrot.slane %v3359_v1, %v973_v19  ;;  %v2468_v19 = vld [vmem:[%s3594_s6 + $0xf8] sm:$0xff] }
0x12f4   :  { %v3472_v14 = vadd.f32 %v2062_v8, %v2057_v12 }
0x12f5   :  { %v2068_v15 = vsel %vm35_vm0, %v3470_v13, 0.0  ;;  %v2074_v58 = vmul.f32 %v3470_v13, %v3470_v13 }
0x12f6   :  { %2069 = vadd.xlane.f32.xlu1 %v2068_v15  ;;  %v2065_v17 = vsel %vm35_vm0, %v3472_v14, 0.0  ;;  %v2073_v16 = vmul.f32 %v3472_v14, %v3472_v14 }
0x12f7   :  { %2066 = vadd.xlane.f32.xlu0 %v2065_v17  ;;  %v2078_v20 = vsel %vm35_vm0, %v2074_v58, 0.0 }
0x12f8   :  { %v2075_v51 = vsel %vm35_vm0, %v2073_v16, 0.0 }
0x12fb   :  { %2076 = vadd.xlane.f32.xlu0 %v2075_v51 }
0x12ff   :  { %2079 = vadd.xlane.f32.xlu0 %v2078_v20  ;;  %v2916_v20 = vpack.c.bf16 %v2468_v19, %v2467_v18 }
0x1301   :  { %2917 = vmatprep.subr.bf16.mxu0 %v2916_v20 }
0x1302   :  { %2919 = vmatpush3.bf16.msra.mxu0 %v2916_v20 }
0x1383   :  { %v2070_v57 = vpop.xlane.xlu1 %2069 }
0x1384   :  { %v2067_v54 = vpop.xlane.xlu0 %2066  ;;  %v2072_v61 = vmul.f32 0.03125, %v2070_v57 }
0x1385   :  { %v2071_v55 = vmul.f32 0.03125, %v2067_v54 }
0x1386   :  { %v2084_v62 = vmul.f32 %v2072_v61, %v2072_v61  ;;  %v2090_v11 = vsub.f32 %v3470_v13, %v2072_v61 }
0x1387   :  { %v2083_v45 = vmul.f32 %v2071_v55, %v2071_v55  ;;  %v2089_v6 = vsub.f32 %v3472_v14, %v2071_v55 }
0x1388   :  { %v2077_v59 = vpop.xlane.xlu0 %2076 }
0x1389   :  { %v2081_v33 = vmul.f32 0.03125, %v2077_v59 }
0x138b   :  { %v2085_v22 = vsub.f32 %v2081_v33, %v2083_v45 }
0x138c   :  { %v2080_v23 = vpop.xlane.xlu0 %2079 }
0x138d   :  { %v2087_v63 = vmax.f32 %v2085_v22, 0.0  ;;  %v2082_v2 = vmul.f32 0.03125, %v2080_v23 }
0x138f   :  { %v2091_v3 = vadd.f32 1e-05, %v2087_v63  ;;  %v2086_v53 = vsub.f32 %v2082_v2, %v2084_v62 }
0x1391   :  { %2983 = vrsqrt.f32 %v2091_v3  ;;  %v2088_v4 = vmax.f32 %v2086_v53, 0.0 }
0x1393   :  { %v2092_v5 = vadd.f32 1e-05, %v2088_v4 }
0x1395   :  { %2985 = vrsqrt.f32 %v2092_v5 }
0x139b   :  { %v2984_v8 = vpop.eup %2983 }
0x139c   :  { %v2095_v9 = vmul.f32 %v2984_v8, %v2089_v6 }
0x139e   :  { %v2101_v12 = vmul.f32 %v2100_v7, %v2095_v9 }
0x139f   :  { %v2986_v15 = vpop.eup %2985 }
0x13a0   :  { %v2096_v17 = vmul.f32 %v2986_v15, %v2090_v11  ;;  %v2107_v16 = vadd.f32 %v2106_v10, %v2101_v12 }
0x13a2   :  { %v2102_v51 = vmul.f32 %v2100_v7, %v2096_v17  ;;  %2759 = vmatprep.mubr.msk.f32.mxu1 %vm35_vm0, %v2107_v16 }
0x13a4   :  { %v2108_v58 = vadd.f32 %v2106_v10, %v2102_v51 }
0x13a6   :  { %2760 = vmatmul.mubr.msk.f32.vlgmr.msra.gmra.mrb[32].mxu1 %vm35_vm0, %v2108_v58 }
0x13a7   :  { %2923 = vmatpush3.bf16.msra.mxu1 %v2920_v25 }
0x13a8   :  { %2925 = vmatprep.subr.bf16.mxu1 %v2924_v38 }
0x13ab   :  { %2927 = vmatpush3.bf16.msra.mxu1 %v2924_v38 }
0x1479   :  { %v2761_v0 = vpop.f32.mrb[32].mxu1 }
0x147a   :  { %v2196_v27 = vadd.f32 %v2761_v0, %v2117_v26  ;;  %v2190_v28 = vpop.f32.mrb[33].mxu1 }
0x147b   :  { %v2191_v29 = vadd.f32 %v2190_v28, %v2117_v26 }
0x147c   :  { %v2200_v35 = vmax.f32 %v2196_v27, 0.0 }
0x147d   :  { %v2199_v31 = vmax.f32 %v2191_v29, 0.0 }
0x147f   :  { %2794 = vmatprep.mubr.f32.mxu0 %v2199_v31 }
0x1480   :  { %2795 = vmatmul.mubr.f32.vlgmr.msra.gmra.mrb[12].mxu0 %v2200_v35 }
0x1553   :  { %v2796_v39 = vpop.f32.mrb[12].mxu0 }
0x1554   :  { %v2294_v40 = vadd.f32 %v2796_v39, %v3470_v13  ;;  %v2284_v41 = vpop.f32.mrb[13].mxu0 }
0x1555   :  { %v2293_v42 = vadd.f32 %v2284_v41, %v3472_v14 }
0x1556   :  { %v2300_v32 = vadd.f32 %v2298_v47, %v2294_v40 }
0x1557   :  { %v2299_v56 = vadd.f32 %v2298_v47, %v2293_v42 }
0x1559   :  { %2805 = vmatprep.mubr.msk.f32.mxu1 %vm35_vm0, %v2299_v56 }
0x155a   :  { %2806 = vmatmul.mubr.msk.f32.vlgmr.msra.gmra.mrb[34].mxu1 %vm35_vm0, %v2300_v32 }
0x162d   :  { %v2807_v43 = vpop.f32.mrb[34].mxu1 }
0x162e   :  { %2387 = vst [vmem:[#allocation2 + $0x8] sm:$0xff] %v2807_v43  ;;  %v2377_v34 = vpop.f32.mrb[35].mxu1 }
0x162f   :  { %2386 = vst [vmem:[#allocation2] sm:$0xff] %v2377_v34 }
0x1630   :  { %2998 = shalt.err (!%p2995_p4)
}
0x1631   :  { %s2999_s24 = scalar_lea.hbm %s3596_s8, 256 }
0x1632   :  { %p3000_p5 = scmp.ne.s32.totalorder %s3596_s8, %s2999_s24  ;;  %p3003_p6 = scmp.lt.u32.totalorder %s2999_s24, %s3596_s8 }
0x1634   :  { %p3005_p7 = pnand %p3003_p6, %p3000_p5 }
0x1636   :  { %3008 = shalt.err (!%p3005_p7)
}
0x1637   :  { %s3020_s4 = smov 128   ;;  %s3021_s11 = smov 8  }
0x1638   :  { %2399 = dma.vmem_to_hbm [thread:$0]  %s2394_s28, 256, %s3596_s8, [#allocation3], %s3020_s4, %s3020_s4, %s3021_s11  }
0x1639   :  { %3009 = dma.done.wait [#allocation3], 256  }
0x163a   :  { %3010 = vsyncadd [#allocation3], 4294967040 }
0x163b   :  { %2403 = vsyncpa [#allocation3], 1 }

</bundles_post_ra>
